<compile_context>
chip_gen: v7x
topology: tpu7x:2x2x1
jax: 0.10.0
libtpu: 0.0.40
codegen_flags: <defaults>
</compile_context>

<pallas_src>
import jax
import jax.numpy as jnp
from jax.experimental import pallas as pl
from jax.experimental.pallas import tpu as pltpu

INPUT_SIZE = 3 * 32 * 32      # 3072 (already a multiple of 128)
HIDDEN = 100
OUTPUT_SIZE = 10

LANE = 128
H_PAD = 128                   # hidden 100 padded to lane width
OUT_PAD = 128                 # output 10 padded to lane width
DEFAULT_BLOCK_B = 512         # batch tile: fits comfortably in v7x's 64 MiB VMEM


def _round_up(n, m):
    return ((n + m - 1) // m) * m


def _mlp_kernel(x_ref,
                w1_ref, b1_ref,
                w2_ref, b2_ref,
                w3_ref, b3_ref,
                w4_ref, b4_ref,
                o_ref):
    # layer 1: (TB,3072) @ (3072,128) + (1,128), ReLU
    h = jnp.dot(x_ref[...], w1_ref[...], preferred_element_type=jnp.float32)
    h = jnp.maximum(h + b1_ref[...], 0.0)
    # layer 2: (TB,128) @ (128,128) + (1,128), ReLU
    h = jnp.dot(h, w2_ref[...], preferred_element_type=jnp.float32)
    h = jnp.maximum(h + b2_ref[...], 0.0)
    # layer 3: (TB,128) @ (128,128) + (1,128), ReLU
    h = jnp.dot(h, w3_ref[...], preferred_element_type=jnp.float32)
    h = jnp.maximum(h + b3_ref[...], 0.0)
    # layer 4 (no ReLU): (TB,128) @ (128,128) + (1,128)
    out = jnp.dot(h, w4_ref[...], preferred_element_type=jnp.float32)
    o_ref[...] = (out + b4_ref[...]).astype(o_ref.dtype)


def neural_net_relu_forward(x, padded_params, *, block_b=DEFAULT_BLOCK_B):
    """x: (B, 3, 32, 32) float32 (NCHW, like the PyTorch module).

    padded_params: output of pad_params(init_params(...)) — lane-padded once.
    Returns (B, 10) float32 logits.
    """
    b = x.shape[0]
    x2d = x.reshape(b, INPUT_SIZE).astype(jnp.float32)   # == torch .view(-1, 32*32*3)

    # Batch tile: multiple of 8 (sublane), capped at block_b.
    tb = min(block_b, _round_up(b, 8))
    b_pad = _round_up(b, tb)
    if b_pad != b:
        x2d = jnp.pad(x2d, ((0, b_pad - b), (0, 0)))

    w1, b1, w2, b2, w3, b3, w4, b4 = padded_params

    grid = (b_pad // tb,)

    flops = 2 * b_pad * (INPUT_SIZE * H_PAD + 2 * H_PAD * H_PAD + H_PAD * OUT_PAD)
    bytes_accessed = 4 * (x2d.size + b_pad * OUT_PAD
                          + w1.size + w2.size + w3.size + w4.size
                          + b1.size + b2.size + b3.size + b4.size)

    const = lambda i: (0, 0)      # weights/biases resident across grid steps
    out = pl.pallas_call(
        _mlp_kernel,
        out_shape=jax.ShapeDtypeStruct((b_pad, OUT_PAD), jnp.float32),
        grid=grid,
        in_specs=[
            pl.BlockSpec((tb, INPUT_SIZE), lambda i: (i, 0)),   # x tile (pipelined)
            pl.BlockSpec((INPUT_SIZE, H_PAD), const),           # W1
            pl.BlockSpec((1, H_PAD), const),                    # b1
            pl.BlockSpec((H_PAD, H_PAD), const),                # W2
            pl.BlockSpec((1, H_PAD), const),                    # b2
            pl.BlockSpec((H_PAD, H_PAD), const),                # W3
            pl.BlockSpec((1, H_PAD), const),                    # b3
            pl.BlockSpec((H_PAD, OUT_PAD), const),              # W4
            pl.BlockSpec((1, OUT_PAD), const),                  # b4
        ],
        out_specs=pl.BlockSpec((tb, OUT_PAD), lambda i: (i, 0)),  # lane-dense store
        compiler_params=pltpu.CompilerParams(
            dimension_semantics=("parallel",),     # shard batch tiles across TCs (v7x)
            vmem_limit_bytes=32 << 20,             # ~20 MiB actually needed at TB=512
        ),
        cost_estimate=pl.CostEstimate(
            flops=flops, transcendentals=0, bytes_accessed=bytes_accessed),
    )(x2d, w1, b1, w2, b2, w3, b3, w4, b4)

    return out[:b, :OUTPUT_SIZE]


def init_params(key):
    """Unpadded params mimicking nn.Linear default init (U[-1/sqrt(fan_in), +...]).

    Weights are stored as (in_features, out_features) so the kernel computes
    out = x @ W + b, identical to nn.Linear's y = x @ W.T + b.
    """
    def linear(key, fan_in, fan_out):
        kw, kb = jax.random.split(key)
        bound = 1.0 / (fan_in ** 0.5)
        w = jax.random.uniform(kw, (fan_in, fan_out), jnp.float32, -bound, bound)
        b = jax.random.uniform(kb, (1, fan_out), jnp.float32, -bound, bound)
        return w, b

    k1, k2, k3, k4 = jax.random.split(key, 4)
    w1, b1 = linear(k1, INPUT_SIZE, HIDDEN)
    w2, b2 = linear(k2, HIDDEN, HIDDEN)
    w3, b3 = linear(k3, HIDDEN, HIDDEN)
    w4, b4 = linear(k4, HIDDEN, OUTPUT_SIZE)
    return (w1, b1, w2, b2, w3, b3, w4, b4)


def pad_params(params):
    """Zero-pad feature dims to 128 lanes — done once, not per call."""
    w1, b1, w2, b2, w3, b3, w4, b4 = params

    def pad2(a, rows, cols):
        return jnp.pad(a, ((0, rows - a.shape[0]), (0, cols - a.shape[1])))

    return (
        pad2(w1, INPUT_SIZE, H_PAD), pad2(b1, 1, H_PAD),
        pad2(w2, H_PAD, H_PAD),      pad2(b2, 1, H_PAD),
        pad2(w3, H_PAD, H_PAD),      pad2(b3, 1, H_PAD),
        pad2(w4, H_PAD, OUT_PAD),    pad2(b4, 1, OUT_PAD),
    )


if __name__ == "__main__":
    key = jax.random.PRNGKey(0)
    kx, kp = jax.random.split(key)

    batch = 2
    x = jax.random.normal(kx, (batch, 3, 32, 32), jnp.float32)   # NCHW like torch
    params = init_params(kp)
    padded = pad_params(params)

    out = neural_net_relu_forward(x, padded)
    out = jax.block_until_ready(out)
    assert out.shape == (batch, OUTPUT_SIZE)

    # Pure-JAX reference of the same math (unpadded weights).
    w1, b1, w2, b2, w3, b3, w4, b4 = params
    h = x.reshape(batch, INPUT_SIZE)
    h = jnp.maximum(h @ w1 + b1, 0.0)
    h = jnp.maximum(h @ w2 + b2, 0.0)
    h = jnp.maximum(h @ w3 + b3, 0.0)
    ref = h @ w4 + b4
    assert jnp.allclose(out, ref, atol=1e-4, rtol=1e-4)

    print("KERNEL_OK")
</pallas_src>

<mosaic_0001>
module attributes {stable_mosaic.version = 11 : i64} {
  func.func @_mlp_kernel(%arg0: i32, %arg1: memref<8x3072xf32, #tpu.memory_space<vmem>>, %arg2: memref<3072x128xf32, #tpu.memory_space<vmem>>, %arg3: memref<1x128xf32, #tpu.memory_space<vmem>>, %arg4: memref<128x128xf32, #tpu.memory_space<vmem>>, %arg5: memref<1x128xf32, #tpu.memory_space<vmem>>, %arg6: memref<128x128xf32, #tpu.memory_space<vmem>>, %arg7: memref<1x128xf32, #tpu.memory_space<vmem>>, %arg8: memref<128x128xf32, #tpu.memory_space<vmem>>, %arg9: memref<1x128xf32, #tpu.memory_space<vmem>>, %arg10: memref<8x128xf32, #tpu.memory_space<vmem>>) attributes {dimension_semantics = [#tpu.dimension_semantics<parallel>], iteration_bounds = array<i64: 1>, scalar_prefetch = 0 : i64, scratch_operands = 0 : i64, tpu.core_type = #tpu.core_type<tc>, window_params = [{transform_indices = @transform_0, window_bounds = array<i64: 8, 3072>}, {pipeline_mode = #tpu.pipeline_mode<synchronous>, transform_indices = @transform_1, window_bounds = array<i64: 3072, 128>}, {pipeline_mode = #tpu.pipeline_mode<synchronous>, transform_indices = @transform_2, window_bounds = array<i64: 1, 128>}, {pipeline_mode = #tpu.pipeline_mode<synchronous>, transform_indices = @transform_3, window_bounds = array<i64: 128, 128>}, {pipeline_mode = #tpu.pipeline_mode<synchronous>, transform_indices = @transform_4, window_bounds = array<i64: 1, 128>}, {pipeline_mode = #tpu.pipeline_mode<synchronous>, transform_indices = @transform_5, window_bounds = array<i64: 128, 128>}, {pipeline_mode = #tpu.pipeline_mode<synchronous>, transform_indices = @transform_6, window_bounds = array<i64: 1, 128>}, {pipeline_mode = #tpu.pipeline_mode<synchronous>, transform_indices = @transform_7, window_bounds = array<i64: 128, 128>}, {pipeline_mode = #tpu.pipeline_mode<synchronous>, transform_indices = @transform_8, window_bounds = array<i64: 1, 128>}, {transform_indices = @transform_9, window_bounds = array<i64: 8, 128>}]} {
    %c0 = arith.constant 0 : index
    %c0_0 = arith.constant 0 : index
    %0 = vector.load %arg1[%c0, %c0_0] : memref<8x3072xf32, #tpu.memory_space<vmem>>, vector<8x3072xf32>
    %c0_1 = arith.constant 0 : index
    %c0_2 = arith.constant 0 : index
    %1 = vector.load %arg2[%c0_1, %c0_2] : memref<3072x128xf32, #tpu.memory_space<vmem>>, vector<3072x128xf32>
    %cst = arith.constant dense<0.000000e+00> : vector<8x128xf32>
    %2 = tpu.matmul %0, %1, %cst {dimension_numbers = #tpu.dot_dimension_numbers<[1], [0], [0], [1], [0, 0, 1, 1], [], []>} : vector<8x3072xf32>, vector<3072x128xf32>, vector<8x128xf32> -> vector<8x128xf32>
    %c0_3 = arith.constant 0 : index
    %c0_4 = arith.constant 0 : index
    %3 = vector.load %arg3[%c0_3, %c0_4] : memref<1x128xf32, #tpu.memory_space<vmem>>, vector<1x128xf32>
    %4 = vector.broadcast %3 : vector<1x128xf32> to vector<8x128xf32>
    %5 = arith.addf %2, %4 : vector<8x128xf32>
    %cst_5 = arith.constant 0.000000e+00 : f32
    %6 = vector.broadcast %cst_5 : f32 to vector<8x128xf32>
    %7 = arith.maximumf %5, %6 : vector<8x128xf32>
    %c0_6 = arith.constant 0 : index
    %c0_7 = arith.constant 0 : index
    %8 = vector.load %arg4[%c0_6, %c0_7] : memref<128x128xf32, #tpu.memory_space<vmem>>, vector<128x128xf32>
    %cst_8 = arith.constant dense<0.000000e+00> : vector<8x128xf32>
    %9 = tpu.matmul %7, %8, %cst_8 {dimension_numbers = #tpu.dot_dimension_numbers<[1], [0], [0], [1], [0, 0, 1, 1], [], []>} : vector<8x128xf32>, vector<128x128xf32>, vector<8x128xf32> -> vector<8x128xf32>
    %c0_9 = arith.constant 0 : index
    %c0_10 = arith.constant 0 : index
    %10 = vector.load %arg5[%c0_9, %c0_10] : memref<1x128xf32, #tpu.memory_space<vmem>>, vector<1x128xf32>
    %11 = vector.broadcast %10 : vector<1x128xf32> to vector<8x128xf32>
    %12 = arith.addf %9, %11 : vector<8x128xf32>
    %cst_11 = arith.constant 0.000000e+00 : f32
    %13 = vector.broadcast %cst_11 : f32 to vector<8x128xf32>
    %14 = arith.maximumf %12, %13 : vector<8x128xf32>
    %c0_12 = arith.constant 0 : index
    %c0_13 = arith.constant 0 : index
    %15 = vector.load %arg6[%c0_12, %c0_13] : memref<128x128xf32, #tpu.memory_space<vmem>>, vector<128x128xf32>
    %cst_14 = arith.constant dense<0.000000e+00> : vector<8x128xf32>
    %16 = tpu.matmul %14, %15, %cst_14 {dimension_numbers = #tpu.dot_dimension_numbers<[1], [0], [0], [1], [0, 0, 1, 1], [], []>} : vector<8x128xf32>, vector<128x128xf32>, vector<8x128xf32> -> vector<8x128xf32>
    %c0_15 = arith.constant 0 : index
    %c0_16 = arith.constant 0 : index
    %17 = vector.load %arg7[%c0_15, %c0_16] : memref<1x128xf32, #tpu.memory_space<vmem>>, vector<1x128xf32>
    %18 = vector.broadcast %17 : vector<1x128xf32> to vector<8x128xf32>
    %19 = arith.addf %16, %18 : vector<8x128xf32>
    %cst_17 = arith.constant 0.000000e+00 : f32
    %20 = vector.broadcast %cst_17 : f32 to vector<8x128xf32>
    %21 = arith.maximumf %19, %20 : vector<8x128xf32>
    %c0_18 = arith.constant 0 : index
    %c0_19 = arith.constant 0 : index
    %22 = vector.load %arg8[%c0_18, %c0_19] : memref<128x128xf32, #tpu.memory_space<vmem>>, vector<128x128xf32>
    %cst_20 = arith.constant dense<0.000000e+00> : vector<8x128xf32>
    %23 = tpu.matmul %21, %22, %cst_20 {dimension_numbers = #tpu.dot_dimension_numbers<[1], [0], [0], [1], [0, 0, 1, 1], [], []>} : vector<8x128xf32>, vector<128x128xf32>, vector<8x128xf32> -> vector<8x128xf32>
    %c0_21 = arith.constant 0 : index
    %c0_22 = arith.constant 0 : index
    %24 = vector.load %arg9[%c0_21, %c0_22] : memref<1x128xf32, #tpu.memory_space<vmem>>, vector<1x128xf32>
    %25 = vector.broadcast %24 : vector<1x128xf32> to vector<8x128xf32>
    %26 = arith.addf %23, %25 : vector<8x128xf32>
    %c0_23 = arith.constant 0 : index
    %c0_24 = arith.constant 0 : index
    %27 = vector.load %arg10[%c0_23, %c0_24] : memref<8x128xf32, #tpu.memory_space<vmem>>, vector<8x128xf32>
    tpu.vector_store %arg10[%c0_23, %c0_24], %26 {strides = array<i32>} : memref<8x128xf32, #tpu.memory_space<vmem>>, vector<8x128xf32>,
    return
  }
  func.func @transform_0(%arg0: i32) -> (i32, i32) {
    %c0_i32 = arith.constant 0 : i32
    %c0_i32_0 = arith.constant 0 : i32
    return %arg0, %c0_i32 : i32, i32
  }
  func.func @transform_1(%arg0: i32) -> (i32, i32) {
    %c0_i32 = arith.constant 0 : i32
    %c0_i32_0 = arith.constant 0 : i32
    %c0_i32_1 = arith.constant 0 : i32
    return %c0_i32, %c0_i32_0 : i32, i32
  }
  func.func @transform_2(%arg0: i32) -> (i32, i32) {
    %c0_i32 = arith.constant 0 : i32
    %c0_i32_0 = arith.constant 0 : i32
    %c0_i32_1 = arith.constant 0 : i32
    return %c0_i32, %c0_i32_0 : i32, i32
  }
  func.func @transform_3(%arg0: i32) -> (i32, i32) {
    %c0_i32 = arith.constant 0 : i32
    %c0_i32_0 = arith.constant 0 : i32
    %c0_i32_1 = arith.constant 0 : i32
    return %c0_i32, %c0_i32_0 : i32, i32
  }
  func.func @transform_4(%arg0: i32) -> (i32, i32) {
    %c0_i32 = arith.constant 0 : i32
    %c0_i32_0 = arith.constant 0 : i32
    %c0_i32_1 = arith.constant 0 : i32
    return %c0_i32, %c0_i32_0 : i32, i32
  }
  func.func @transform_5(%arg0: i32) -> (i32, i32) {
    %c0_i32 = arith.constant 0 : i32
    %c0_i32_0 = arith.constant 0 : i32
    %c0_i32_1 = arith.constant 0 : i32
    return %c0_i32, %c0_i32_0 : i32, i32
  }
  func.func @transform_6(%arg0: i32) -> (i32, i32) {
    %c0_i32 = arith.constant 0 : i32
    %c0_i32_0 = arith.constant 0 : i32
    %c0_i32_1 = arith.constant 0 : i32
    return %c0_i32, %c0_i32_0 : i32, i32
  }
  func.func @transform_7(%arg0: i32) -> (i32, i32) {
    %c0_i32 = arith.constant 0 : i32
    %c0_i32_0 = arith.constant 0 : i32
    %c0_i32_1 = arith.constant 0 : i32
    return %c0_i32, %c0_i32_0 : i32, i32
  }
  func.func @transform_8(%arg0: i32) -> (i32, i32) {
    %c0_i32 = arith.constant 0 : i32
    %c0_i32_0 = arith.constant 0 : i32
    %c0_i32_1 = arith.constant 0 : i32
    return %c0_i32, %c0_i32_0 : i32, i32
  }
  func.func @transform_9(%arg0: i32) -> (i32, i32) {
    %c0_i32 = arith.constant 0 : i32
    %c0_i32_0 = arith.constant 0 : i32
    return %arg0, %c0_i32 : i32, i32
  }
}

</mosaic_0001>

<bundles_post_ra>
// kernel: tpu_custom_call.1
= control target key start
LH: loop header
LB: loop body
LE: loop exit
PB: predicated region body
PF: predicated region fallthrough
CT: control target
= control target key end

     0   :  { %14 = vsyncpa [#allocation3], 0  ;;  %s3212_s0 = inlined_call_operand.hbm [shape: f32[8,3072], index: 0, kind: input, shape index: {}]   ;;  %s3213_s1 = inlined_call_operand.hbm [shape: f32[3072,128], index: 1, kind: input, shape index: {}]   ;;  %s3214_s2 = inlined_call_operand.hbm [shape: f32[1,128], index: 2, kind: input, shape index: {}]   ;;  %s3215_s3 = inlined_call_operand.hbm [shape: f32[128,128], index: 3, kind: input, shape index: {}]   ;;  %s3216_s4 = inlined_call_operand.hbm [shape: f32[1,128], index: 4, kind: input, shape index: {}]   ;;  %s3217_s5 = inlined_call_operand.hbm [shape: f32[128,128], index: 5, kind: input, shape index: {}]   ;;  %s3218_s6 = inlined_call_operand.hbm [shape: f32[1,128], index: 6, kind: input, shape index: {}]   ;;  %s3219_s7 = inlined_call_operand.hbm [shape: f32[128,128], index: 7, kind: input, shape index: {}]   ;;  %s3220_s8 = inlined_call_operand.hbm [shape: f32[1,128], index: 8, kind: input, shape index: {}]   ;;  %s3221_s9 = inlined_call_operand.hbm [shape: f32[8,128], index: 9, kind: output, shape index: {}]  }
   0x1   :  { %15 = vsyncpa [#allocation6], 0 }
   0x2   :  { %16 = vsyncpa [#allocation9], 0 }
   0x3   :  { %17 = vsyncpa [#allocation12], 0 }
   0x4   :  { %18 = vsyncpa [#allocation15], 0 }
   0x5   :  { %19 = vsyncpa [#allocation4], 0  ;;  %s2985_s30 = smov [#allocation5]   ;;  %s2753_s13 = scalar_lea.hbm %s3213_s1, 49152 }
   0x6   :  { %s35_s10 = sshll.u32 %s2985_s30, 4  ;;  %p2754_p0 = scmp.ne.s32.totalorder %s3213_s1, %s2753_s13  ;;  %s36_s10 = int_to_ptr.vmem [resolvable:$true] %s35_s10 }
   0x7   :  { %p2757_p1 = scmp.lt.u32.totalorder %s2753_s13, %s3213_s1 }
   0x9   :  { %p2759_p2 = pnand %p2757_p1, %p2754_p0 }
   0xb   :  { %2762 = shalt.err (!%p2759_p2)
}
   0xc   :  { %s2763_s18 = scalar_lea.vmem %s36_s10, 49152  ;;  %p2768_p4 = scmp.lt.s32.totalorder %s36_s10, %s36_s10 }
   0xd   :  { %p2764_p3 = scmp.ne.s32.totalorder %s36_s10, %s2763_s18  ;;  %p2769_p5 = scmp.lt.s32.totalorder %s2763_s18, %s2763_s18 }
   0xf   :  { %p2770_p6 = por %p2769_p5, %p2768_p4 }
  0x11   :  { %p2771_p7 = pnand %p2770_p6, %p2764_p3 }
  0x13   :  { %2774 = shalt.err (!%p2771_p7)
}
  0x14   :  { %s2986_s19 = smov 128   ;;  %s2987_s20 = smov 8  }
  0x15   :  { %41 = dma.hbm_to_vmem [thread:$0]  %s3213_s1, 49152, %s36_s10, [#allocation6], %s2986_s19, %s2986_s19, %s2987_s20  }
  0x16   :  { %s2988_s23 = smov [#allocation8]   ;;  %s2989_s25 = smov [#allocation11]  }
  0x17   :  { %s57_s24 = sshll.u32 %s2988_s23, 4  ;;  %s79_s26 = sshll.u32 %s2989_s25, 4  ;;  %s58_s24 = int_to_ptr.vmem [resolvable:$true] %s57_s24  ;;  %s80_s26 = int_to_ptr.vmem [resolvable:$true] %s79_s26 }
  0x18   :  { %s2775_s29 = scalar_lea.hbm %s3215_s3, 2048 }
  0x19   :  { %p2776_p8 = scmp.ne.s32.totalorder %s3215_s3, %s2775_s29  ;;  %p2779_p9 = scmp.lt.u32.totalorder %s2775_s29, %s3215_s3 }
  0x1b   :  { %p2781_p10 = pnand %p2779_p9, %p2776_p8 }
  0x1d   :  { %2784 = shalt.err (!%p2781_p10)
}
  0x1e   :  { %s2785_s1 = scalar_lea.vmem %s58_s24, 2048  ;;  %p2790_p12 = scmp.lt.s32.totalorder %s58_s24, %s58_s24 }
  0x1f   :  { %p2786_p11 = scmp.ne.s32.totalorder %s58_s24, %s2785_s1  ;;  %p2791_p13 = scmp.lt.s32.totalorder %s2785_s1, %s2785_s1 }
  0x21   :  { %p2792_p0 = por %p2791_p13, %p2790_p12 }
  0x23   :  { %p2793_p1 = pnand %p2792_p0, %p2786_p11 }
  0x25   :  { %2796 = shalt.err (!%p2793_p1)
}
  0x26   :  { %63 = dma.hbm_to_vmem [thread:$0]  %s3215_s3, 2048, %s58_s24, [#allocation9], %s2986_s19, %s2986_s19, %s2987_s20  }
  0x27   :  { %s2797_s17 = scalar_lea.hbm %s3217_s5, 2048 }
  0x28   :  { %p2798_p2 = scmp.ne.s32.totalorder %s3217_s5, %s2797_s17  ;;  %p2801_p3 = scmp.lt.u32.totalorder %s2797_s17, %s3217_s5 }
  0x2a   :  { %p2803_p4 = pnand %p2801_p3, %p2798_p2 }
  0x2c   :  { %2806 = shalt.err (!%p2803_p4)
}
  0x2d   :  { %s2807_s25 = scalar_lea.vmem %s80_s26, 2048  ;;  %p2812_p6 = scmp.lt.s32.totalorder %s80_s26, %s80_s26 }
  0x2e   :  { %p2808_p5 = scmp.ne.s32.totalorder %s80_s26, %s2807_s25  ;;  %p2813_p7 = scmp.lt.s32.totalorder %s2807_s25, %s2807_s25 }
  0x30   :  { %p2814_p8 = por %p2813_p7, %p2812_p6 }
  0x32   :  { %p2815_p9 = pnand %p2814_p8, %p2808_p5 }
  0x34   :  { %2818 = shalt.err (!%p2815_p9)
}
  0x35   :  { %85 = dma.hbm_to_vmem [thread:$0]  %s3217_s5, 2048, %s80_s26, [#allocation12], %s2986_s19, %s2986_s19, %s2987_s20  }
  0x36   :  { %s2990_s27 = smov [#allocation14]   ;;  %s2991_s29 = smov [#allocation2]  }
  0x37   :  { %s101_s28 = sshll.u32 %s2990_s27, 4  ;;  %s26_s30 = sshll.u32 %s2991_s29, 4  ;;  %s102_s28 = int_to_ptr.vmem [resolvable:$true] %s101_s28  ;;  %s27_s30 = int_to_ptr.vmem [resolvable:$true] %s26_s30 }
  0x38   :  { %s2819_s13 = scalar_lea.hbm %s3219_s7, 2048 }
  0x39   :  { %p2820_p10 = scmp.ne.s32.totalorder %s3219_s7, %s2819_s13  ;;  %p2823_p11 = scmp.lt.u32.totalorder %s2819_s13, %s3219_s7 }
  0x3b   :  { %p2825_p12 = pnand %p2823_p11, %p2820_p10 }
  0x3d   :  { %2828 = shalt.err (!%p2825_p12)
}
  0x3e   :  { %s2829_s5 = scalar_lea.vmem %s102_s28, 2048  ;;  %p2834_p0 = scmp.lt.s32.totalorder %s102_s28, %s102_s28 }
  0x3f   :  { %p2830_p13 = scmp.ne.s32.totalorder %s102_s28, %s2829_s5  ;;  %p2835_p1 = scmp.lt.s32.totalorder %s2829_s5, %s2829_s5 }
  0x41   :  { %p2836_p2 = por %p2835_p1, %p2834_p0 }
  0x43   :  { %p2837_p3 = pnand %p2836_p2, %p2830_p13 }
  0x45   :  { %2840 = shalt.err (!%p2837_p3)
}
  0x46   :  { %107 = dma.hbm_to_vmem [thread:$0]  %s3219_s7, 2048, %s102_s28, [#allocation15], %s2986_s19, %s2986_s19, %s2987_s20  }
  0x47   :  { %s2841_s21 = scalar_lea.hbm %s3212_s0, 3072 }
  0x48   :  { %p2842_p4 = scmp.ne.s32.totalorder %s3212_s0, %s2841_s21  ;;  %p2845_p5 = scmp.lt.u32.totalorder %s2841_s21, %s3212_s0 }
  0x4a   :  { %p2847_p6 = pnand %p2845_p5, %p2842_p4 }
  0x4c   :  { %2850 = shalt.err (!%p2847_p6)
}
  0x4d   :  { %s2851_s24 = scalar_lea.vmem %s27_s30, 3072  ;;  %p2856_p8 = scmp.lt.s32.totalorder %s27_s30, %s27_s30 }
  0x4e   :  { %p2852_p7 = scmp.ne.s32.totalorder %s27_s30, %s2851_s24  ;;  %p2857_p9 = scmp.lt.s32.totalorder %s2851_s24, %s2851_s24 }
  0x50   :  { %p2858_p10 = por %p2857_p9, %p2856_p8 }
  0x52   :  { %p2859_p11 = pnand %p2858_p10, %p2852_p7 }
  0x54   :  { %2862 = shalt.err (!%p2859_p11)
}
  0x55   :  { %29 = dma.hbm_to_vmem [thread:$0]  %s3212_s0, 3072, %s27_s30, [#allocation3]  }
  0x56   :  { %s2992_s20 = smov [#allocation7]   ;;  %s2993_s28 = smov [#allocation10]  }
  0x57   :  { %s48_s27 = sshll.u32 %s2992_s20, 4  ;;  %s70_s29 = sshll.u32 %s2993_s28, 4  ;;  %s49_s27 = int_to_ptr.vmem [resolvable:$true] %s48_s27  ;;  %s71_s29 = int_to_ptr.vmem [resolvable:$true] %s70_s29 }
  0x58   :  { %s2863_s13 = scalar_lea.hbm %s3214_s2, 16 }
  0x59   :  { %p2864_p12 = scmp.ne.s32.totalorder %s3214_s2, %s2863_s13  ;;  %p2867_p13 = scmp.lt.u32.totalorder %s2863_s13, %s3214_s2 }
  0x5b   :  { %p2869_p0 = pnand %p2867_p13, %p2864_p12 }
  0x5d   :  { %2872 = shalt.err (!%p2869_p0)
}
  0x5e   :  { %s2873_s0 = scalar_lea.vmem %s49_s27, 16  ;;  %s2877_s30 = scalar_lea.vmem %s49_s27, 32 }
  0x5f   :  { %p2874_p1 = scmp.ne.s32.totalorder %s49_s27, %s2873_s0  ;;  %p2878_p2 = scmp.lt.s32.totalorder %s49_s27, %s49_s27 }
  0x60   :  { %p2879_p3 = scmp.lt.s32.totalorder %s2877_s30, %s2873_s0 }
  0x62   :  { %p2880_p4 = por %p2879_p3, %p2878_p2 }
  0x64   :  { %p2881_p5 = pnand %p2880_p4, %p2874_p1 }
  0x66   :  { %2884 = shalt.err (!%p2881_p5)
}
  0x67   :  { %51 = dma.hbm_to_vmem [thread:$0]  %s3214_s2, 16, %s49_s27, [#allocation6]  }
  0x68   :  { %s2885_s18 = scalar_lea.hbm %s3216_s4, 16 }
  0x69   :  { %p2886_p6 = scmp.ne.s32.totalorder %s3216_s4, %s2885_s18  ;;  %p2889_p7 = scmp.lt.u32.totalorder %s2885_s18, %s3216_s4 }
  0x6b   :  { %p2891_p8 = pnand %p2889_p7, %p2886_p6 }
  0x6d   :  { %2894 = shalt.err (!%p2891_p8)
}
  0x6e   :  { %s2895_s3 = scalar_lea.vmem %s71_s29, 16  ;;  %s2899_s24 = scalar_lea.vmem %s71_s29, 32 }
  0x6f   :  { %p2896_p9 = scmp.ne.s32.totalorder %s71_s29, %s2895_s3  ;;  %p2900_p10 = scmp.lt.s32.totalorder %s71_s29, %s71_s29 }
  0x70   :  { %p2901_p11 = scmp.lt.s32.totalorder %s2899_s24, %s2895_s3 }
  0x72   :  { %p2902_p12 = por %p2901_p11, %p2900_p10 }
  0x74   :  { %p2903_p13 = pnand %p2902_p12, %p2896_p9 }
  0x76   :  { %2906 = shalt.err (!%p2903_p13)
}
  0x77   :  { %73 = dma.hbm_to_vmem [thread:$0]  %s3216_s4, 16, %s71_s29, [#allocation9]  }
  0x78   :  { %s2994_s19 = smov [#allocation13]   ;;  %s2995_s27 = smov [#allocation16]  }
  0x79   :  { %s92_s20 = sshll.u32 %s2994_s19, 4  ;;  %s114_s28 = sshll.u32 %s2995_s27, 4  ;;  %s93_s20 = int_to_ptr.vmem [resolvable:$true] %s92_s20  ;;  %s115_s28 = int_to_ptr.vmem [resolvable:$true] %s114_s28 }
  0x7a   :  { %s2907_s13 = scalar_lea.hbm %s3218_s6, 16 }
  0x7b   :  { %p2908_p0 = scmp.ne.s32.totalorder %s3218_s6, %s2907_s13  ;;  %p2911_p1 = scmp.lt.u32.totalorder %s2907_s13, %s3218_s6 }
  0x7d   :  { %p2913_p2 = pnand %p2911_p1, %p2908_p0 }
  0x7f   :  { %2916 = shalt.err (!%p2913_p2)
}
  0x80   :  { %s2917_s4 = scalar_lea.vmem %s93_s20, 16  ;;  %s2921_s29 = scalar_lea.vmem %s93_s20, 32 }
  0x81   :  { %p2918_p3 = scmp.ne.s32.totalorder %s93_s20, %s2917_s4  ;;  %p2922_p4 = scmp.lt.s32.totalorder %s93_s20, %s93_s20 }
  0x82   :  { %p2923_p5 = scmp.lt.s32.totalorder %s2921_s29, %s2917_s4 }
  0x84   :  { %p2924_p6 = por %p2923_p5, %p2922_p4 }
  0x86   :  { %p2925_p7 = pnand %p2924_p6, %p2918_p3 }
  0x88   :  { %2928 = shalt.err (!%p2925_p7)
}
  0x89   :  { %95 = dma.hbm_to_vmem [thread:$0]  %s3218_s6, 16, %s93_s20, [#allocation12]  }
  0x8a   :  { %s2929_s16 = scalar_lea.hbm %s3220_s8, 16 }
  0x8b   :  { %p2930_p8 = scmp.ne.s32.totalorder %s3220_s8, %s2929_s16  ;;  %p2933_p9 = scmp.lt.u32.totalorder %s2929_s16, %s3220_s8 }
  0x8d   :  { %p2935_p10 = pnand %p2933_p9, %p2930_p8 }
  0x8f   :  { %2938 = shalt.err (!%p2935_p10)
}
  0x90   :  { %s2939_s23 = scalar_lea.vmem %s115_s28, 16  ;;  %s2943_s25 = scalar_lea.vmem %s115_s28, 32 }
  0x91   :  { %p2940_p11 = scmp.ne.s32.totalorder %s115_s28, %s2939_s23  ;;  %p2944_p12 = scmp.lt.s32.totalorder %s115_s28, %s115_s28 }
  0x92   :  { %p2945_p13 = scmp.lt.s32.totalorder %s2943_s25, %s2939_s23 }
  0x94   :  { %p2946_p0 = por %p2945_p13, %p2944_p12 }
  0x96   :  { %p2947_p1 = pnand %p2946_p0, %p2940_p11 }
  0x98   :  { %2950 = shalt.err (!%p2947_p1)
}
  0x99   :  { %117 = dma.hbm_to_vmem [thread:$0]  %s3220_s8, 16, %s115_s28, [#allocation15]  }
  0x9a   :  { %2973 = dma.done.wait [#allocation3], 3072  }
  0x9b   :  { %2974 = vsyncadd [#allocation3], 4294964224 }
  0x9c   :  { %2975 = dma.done.wait [#allocation6], 49168  }
  0x9d   :  { %2976 = vsyncadd [#allocation6], 4294918128 }
  0x9e   :  { %2977 = dma.done.wait [#allocation9], 2064  }
  0x9f   :  { %2978 = vsyncadd [#allocation9], 4294965232 }
  0xa0   :  { %2979 = dma.done.wait [#allocation12], 2064  }
  0xa1   :  { %2980 = vsyncadd [#allocation12], 4294965232 }
  0xa2   :  { %2981 = dma.done.wait [#allocation15], 2064  }
  0xa3   :  { %2982 = vsyncadd [#allocation15], 4294965232  ;;  %v185_v0 = vld [vmem:[#allocation5 + $0x80] sm:$0xff]  ;;  %v186_v1 = vld [vmem:[#allocation5 + $0x88] sm:$0xff]  ;;  %vm2997_vm0 = vmmov 0   ;;  %s2999_s8 = smov [#allocation17]  }
  0xa4   :  { %v169_v2 = vld [vmem:[#allocation5] sm:$0xff]  ;;  %v2282_v3 = vpack.c.bf16 %v186_v1, %v185_v0  ;;  %v170_v4 = vld [vmem:[#allocation5 + $0x8] sm:$0xff]  ;;  %v187_v11 = vld [vmem:[#allocation5 + $0x90] sm:$0xff]  ;;  %s1689_s24 = sshll.u32 %s2999_s8, 4  ;;  %s1690_s24 = int_to_ptr.vmem [resolvable:$true] %s1689_s24 }
  0xa5   :  { %v217_v5 = vld [vmem:[#allocation5 + $0x180] sm:$0xff]  ;;  %v218_v6 = vld [vmem:[#allocation5 + $0x188] sm:$0xff]  ;;  %v2284_v7 = vpack.c.bf16 %v170_v4, %v169_v2  ;;  %v188_v13 = vld [vmem:[#allocation5 + $0x98] sm:$0xff]  ;;  %s2951_s2 = scalar_lea.vmem %s1690_s24, 128  ;;  %p2956_p3 = scmp.lt.s32.totalorder %s1690_s24, %s1690_s24 }
  0xa6   :  { %v2314_v8 = vpack.c.bf16 %v218_v6, %v217_v5  ;;  %v201_v9 = vld [vmem:[#allocation5 + $0x100] sm:$0xff]  ;;  %v202_v10 = vld [vmem:[#allocation5 + $0x108] sm:$0xff]  ;;  %2283 = vmatprep.subr.bf16.mxu0 %v2282_v3  ;;  %v171_v14 = vld [vmem:[#allocation5 + $0x10] sm:$0xff]  ;;  %v2286_v16 = vpack.c.bf16 %v188_v13, %v187_v11  ;;  %p2952_p2 = scmp.ne.s32.totalorder %s1690_s24, %s2951_s2  ;;  %p2957_p4 = scmp.lt.s32.totalorder %s2951_s2, %s2951_s2 }
  0xa7   :  { %v2316_v12 = vpack.c.bf16 %v202_v10, %v201_v9  ;;  %v172_v15 = vld [vmem:[#allocation5 + $0x18] sm:$0xff]  ;;  %2285 = vmatpush3.bf16.msra.mxu0 %v2284_v7  ;;  %v219_v18 = vld [vmem:[#allocation5 + $0x190] sm:$0xff]  ;;  %v189_v23 = vld [vmem:[#allocation5 + $0xa0] sm:$0xff] }
  0xa8   :  { %2315 = vmatprep.subr.bf16.mxu1 %v2314_v8  ;;  %v2288_v17 = vpack.c.bf16 %v172_v15, %v171_v14  ;;  %v220_v19 = vld [vmem:[#allocation5 + $0x198] sm:$0xff]  ;;  %v203_v20 = vld [vmem:[#allocation5 + $0x110] sm:$0xff]  ;;  %v190_v24 = vld [vmem:[#allocation5 + $0xa8] sm:$0xff]  ;;  %2287 = vmatprep.subr.bf16.mxu0 %v2286_v16  ;;  %p2958_p5 = por %p2957_p4, %p2956_p3 }
  0xa9   :  { %2317 = vmatpush3.bf16.msra.mxu1 %v2316_v12  ;;  %v2318_v21 = vpack.c.bf16 %v220_v19, %v219_v18  ;;  %v204_v22 = vld [vmem:[#allocation5 + $0x118] sm:$0xff]  ;;  %v2290_v26 = vpack.c.bf16 %v190_v24, %v189_v23  ;;  %v173_v27 = vld [vmem:[#allocation5 + $0x20] sm:$0xff]  ;;  %v174_v28 = vld [vmem:[#allocation5 + $0x28] sm:$0xff] }
  0xaa   :  { %v2320_v25 = vpack.c.bf16 %v204_v22, %v203_v20  ;;  %v221_v29 = vld [vmem:[#allocation5 + $0x1a0] sm:$0xff]  ;;  %v222_v30 = vld [vmem:[#allocation5 + $0x1a8] sm:$0xff]  ;;  %v2292_v33 = vpack.c.bf16 %v174_v28, %v173_v27  ;;  %v191_v35 = vld [vmem:[#allocation5 + $0xb0] sm:$0xff]  ;;  %p2959_p6 = pnand %p2958_p5, %p2952_p2 }
  0xab   :  { %2319 = vmatprep.subr.bf16.mxu1 %v2318_v21  ;;  %v205_v31 = vld [vmem:[#allocation5 + $0x120] sm:$0xff]  ;;  %v206_v32 = vld [vmem:[#allocation5 + $0x128] sm:$0xff]  ;;  %2289 = vmatpush3.bf16.msra.mxu0 %v2288_v17  ;;  %v2322_v34 = vpack.c.bf16 %v222_v30, %v221_v29  ;;  %v192_v36 = vld [vmem:[#allocation5 + $0xb8] sm:$0xff] }
  0xac   :  { %v175_v37 = vld [vmem:[#allocation5 + $0x30] sm:$0xff]  ;;  %2291 = vmatprep.subr.bf16.mxu0 %v2290_v26  ;;  %v2324_v38 = vpack.c.bf16 %v206_v32, %v205_v31  ;;  %v2294_v39 = vpack.c.bf16 %v192_v36, %v191_v35  ;;  %v176_v40 = vld [vmem:[#allocation5 + $0x38] sm:$0xff]  ;;  %v193_v46 = vld [vmem:[#allocation5 + $0xc0] sm:$0xff] }
  0xad   :  { %2321 = vmatpush3.bf16.msra.mxu1 %v2320_v25  ;;  %v223_v41 = vld [vmem:[#allocation5 + $0x1b0] sm:$0xff]  ;;  %v224_v42 = vld [vmem:[#allocation5 + $0x1b8] sm:$0xff]  ;;  %v194_v47 = vld [vmem:[#allocation5 + $0xc8] sm:$0xff]  ;;  %v2296_v48 = vpack.c.bf16 %v176_v40, %v175_v37 }
  0xae   :  { %2323 = vmatprep.subr.bf16.mxu1 %v2322_v34  ;;  %v2326_v43 = vpack.c.bf16 %v224_v42, %v223_v41  ;;  %v207_v44 = vld [vmem:[#allocation5 + $0x130] sm:$0xff]  ;;  %v208_v45 = vld [vmem:[#allocation5 + $0x138] sm:$0xff]  ;;  %v225_v49 = vld [vmem:[#allocation5 + $0x1c0] sm:$0xff]  ;;  %v2298_v52 = vpack.c.bf16 %v194_v47, %v193_v46 }
  0xaf   :  { %2293 = vmatpush3.bf16.msra.mxu0 %v2292_v33  ;;  %v226_v50 = vld [vmem:[#allocation5 + $0x1c8] sm:$0xff]  ;;  %v2328_v51 = vpack.c.bf16 %v208_v45, %v207_v44  ;;  %v177_v53 = vld [vmem:[#allocation5 + $0x40] sm:$0xff]  ;;  %v195_v58 = vld [vmem:[#allocation5 + $0xd0] sm:$0xff] }
  0xb0   :  { %2295 = vmatprep.subr.bf16.mxu0 %v2294_v39  ;;  %v178_v54 = vld [vmem:[#allocation5 + $0x48] sm:$0xff]  ;;  %v209_v55 = vld [vmem:[#allocation5 + $0x140] sm:$0xff]  ;;  %v2330_v56 = vpack.c.bf16 %v226_v50, %v225_v49  ;;  %v196_v59 = vld [vmem:[#allocation5 + $0xd8] sm:$0xff] }
  0xb1   :  { %2325 = vmatpush3.bf16.msra.mxu1 %v2324_v38  ;;  %v210_v57 = vld [vmem:[#allocation5 + $0x148] sm:$0xff]  ;;  %v227_v60 = vld [vmem:[#allocation5 + $0x1d0] sm:$0xff]  ;;  %v228_v61 = vld [vmem:[#allocation5 + $0x1d8] sm:$0xff]  ;;  %v2300_v62 = vpack.c.bf16 %v178_v54, %v177_v53  ;;  %v2302_v0 = vpack.c.bf16 %v196_v59, %v195_v58 }
  0xb2   :  { %2327 = vmatprep.subr.bf16.mxu1 %v2326_v43  ;;  %v2332_v63 = vpack.c.bf16 %v210_v57, %v209_v55  ;;  %v179_v1 = vld [vmem:[#allocation5 + $0x50] sm:$0xff]  ;;  %v180_v2 = vld [vmem:[#allocation5 + $0x58] sm:$0xff]  ;;  %v2334_v4 = vpack.c.bf16 %v228_v61, %v227_v60  ;;  %v197_v6 = vld [vmem:[#allocation5 + $0xe0] sm:$0xff] }
  0xb3   :  { %2297 = vmatpush3.bf16.msra.mxu0 %v2296_v48  ;;  %v211_v3 = vld [vmem:[#allocation5 + $0x150] sm:$0xff]  ;;  %v212_v5 = vld [vmem:[#allocation5 + $0x158] sm:$0xff]  ;;  %v198_v7 = vld [vmem:[#allocation5 + $0xe8] sm:$0xff]  ;;  %v2304_v10 = vpack.c.bf16 %v180_v2, %v179_v1 }
  0xb4   :  { %2299 = vmatprep.subr.bf16.mxu0 %v2298_v52  ;;  %v229_v8 = vld [vmem:[#allocation5 + $0x1e0] sm:$0xff]  ;;  %v230_v9 = vld [vmem:[#allocation5 + $0x1e8] sm:$0xff]  ;;  %v2336_v13 = vpack.c.bf16 %v212_v5, %v211_v3  ;;  %v2306_v14 = vpack.c.bf16 %v198_v7, %v197_v6  ;;  %v199_v19 = vld [vmem:[#allocation5 + $0xf0] sm:$0xff] }
  0xb5   :  { %2329 = vmatpush3.bf16.msra.mxu1 %v2328_v51  ;;  %v181_v11 = vld [vmem:[#allocation5 + $0x60] sm:$0xff]  ;;  %v182_v12 = vld [vmem:[#allocation5 + $0x68] sm:$0xff]  ;;  %v2338_v18 = vpack.c.bf16 %v230_v9, %v229_v8  ;;  %v200_v20 = vld [vmem:[#allocation5 + $0xf8] sm:$0xff] }
  0xb6   :  { %2331 = vmatprep.subr.bf16.mxu1 %v2330_v56  ;;  %v213_v15 = vld [vmem:[#allocation5 + $0x160] sm:$0xff]  ;;  %v214_v16 = vld [vmem:[#allocation5 + $0x168] sm:$0xff]  ;;  %v148_v21 = vld [vmem:[#allocation2 + $0x18] sm:$0xff]  ;;  %v2308_v24 = vpack.c.bf16 %v182_v12, %v181_v11  ;;  %v2310_v26 = vpack.c.bf16 %v200_v20, %v199_v19 }
  0xb7   :  { %2301 = vmatpush3.bf16.msra.mxu0 %v2300_v62  ;;  %v146_v17 = vld [vmem:[#allocation2 + $0x8] sm:$0xff]  ;;  %v231_v22 = vld [vmem:[#allocation5 + $0x1f0] sm:$0xff]  ;;  %v232_v23 = vld [vmem:[#allocation5 + $0x1f8] sm:$0xff]  ;;  %694 = vmatprep.mubr.f32.mxu1 %v148_v21  ;;  %v2340_v25 = vpack.c.bf16 %v214_v16, %v213_v15 }
  0xb8   :  { %2303 = vmatprep.subr.bf16.mxu0 %v2302_v0  ;;  %624 = vmatprep.mubr.f32.mxu0 %v146_v17  ;;  %v183_v27 = vld [vmem:[#allocation5 + $0x70] sm:$0xff]  ;;  %v184_v28 = vld [vmem:[#allocation5 + $0x78] sm:$0xff]  ;;  %v2342_v30 = vpack.c.bf16 %v232_v23, %v231_v22  ;;  %v249_v32 = vld [vmem:[#allocation5 + $0x280] sm:$0xff] }
  0xb9   :  { %2333 = vmatpush3.bf16.msra.mxu1 %v2332_v63  ;;  %v215_v29 = vld [vmem:[#allocation5 + $0x170] sm:$0xff]  ;;  %v216_v31 = vld [vmem:[#allocation5 + $0x178] sm:$0xff]  ;;  %v250_v33 = vld [vmem:[#allocation5 + $0x288] sm:$0xff]  ;;  %v2312_v36 = vpack.c.bf16 %v184_v28, %v183_v27 }
  0xba   :  { %2335 = vmatprep.subr.bf16.mxu1 %v2334_v4  ;;  %v281_v34 = vld [vmem:[#allocation5 + $0x380] sm:$0xff]  ;;  %v282_v35 = vld [vmem:[#allocation5 + $0x388] sm:$0xff]  ;;  %v2344_v37 = vpack.c.bf16 %v216_v31, %v215_v29  ;;  %v2346_v38 = vpack.c.bf16 %v250_v33, %v249_v32  ;;  %v251_v44 = vld [vmem:[#allocation5 + $0x290] sm:$0xff] }
  0xbb   :  { %2305 = vmatpush3.bf16.msra.mxu0 %v2304_v10  ;;  %v233_v39 = vld [vmem:[#allocation5 + $0x200] sm:$0xff]  ;;  %v234_v40 = vld [vmem:[#allocation5 + $0x208] sm:$0xff]  ;;  %v2378_v42 = vpack.c.bf16 %v282_v35, %v281_v34  ;;  %v252_v45 = vld [vmem:[#allocation5 + $0x298] sm:$0xff] }
  0xbc   :  { %2307 = vmatprep.subr.bf16.mxu0 %v2306_v14  ;;  %v265_v41 = vld [vmem:[#allocation5 + $0x300] sm:$0xff]  ;;  %v266_v43 = vld [vmem:[#allocation5 + $0x308] sm:$0xff]  ;;  %v283_v46 = vld [vmem:[#allocation5 + $0x390] sm:$0xff]  ;;  %v2348_v49 = vpack.c.bf16 %v234_v40, %v233_v39  ;;  %v2350_v52 = vpack.c.bf16 %v252_v45, %v251_v44 }
  0xbd   :  { %2337 = vmatpush3.bf16.msra.mxu1 %v2336_v13  ;;  %v284_v47 = vld [vmem:[#allocation5 + $0x398] sm:$0xff]  ;;  %v145_v48 = vld [vmem:[#allocation2] sm:$0xff]  ;;  %v147_v50 = vld [vmem:[#allocation2 + $0x10] sm:$0xff]  ;;  %v2380_v51 = vpack.c.bf16 %v266_v43, %v265_v41 }
  0xbe   :  { %2339 = vmatprep.subr.bf16.mxu1 %v2338_v18  ;;  %v235_v53 = vld [vmem:[#allocation5 + $0x210] sm:$0xff]  ;;  %v236_v54 = vld [vmem:[#allocation5 + $0x218] sm:$0xff]  ;;  %v2382_v56 = vpack.c.bf16 %v284_v47, %v283_v46  ;;  %v253_v58 = vld [vmem:[#allocation5 + $0x2a0] sm:$0xff] }
  0xbf   :  { %2309 = vmatpush3.bf16.msra.mxu0 %v2308_v24  ;;  %v267_v55 = vld [vmem:[#allocation5 + $0x310] sm:$0xff]  ;;  %v268_v57 = vld [vmem:[#allocation5 + $0x318] sm:$0xff]  ;;  %v254_v59 = vld [vmem:[#allocation5 + $0x2a8] sm:$0xff]  ;;  %v2352_v62 = vpack.c.bf16 %v236_v54, %v235_v53 }
  0xc0   :  { %2311 = vmatprep.subr.bf16.mxu0 %v2310_v26  ;;  %v285_v60 = vld [vmem:[#allocation5 + $0x3a0] sm:$0xff]  ;;  %v286_v61 = vld [vmem:[#allocation5 + $0x3a8] sm:$0xff]  ;;  %v2384_v63 = vpack.c.bf16 %v268_v57, %v267_v55  ;;  %v2354_v0 = vpack.c.bf16 %v254_v59, %v253_v58  ;;  %v255_v6 = vld [vmem:[#allocation5 + $0x2b0] sm:$0xff] }
  0xc1   :  { %2341 = vmatpush3.bf16.msra.mxu1 %v2340_v25  ;;  %v237_v1 = vld [vmem:[#allocation5 + $0x220] sm:$0xff]  ;;  %v238_v2 = vld [vmem:[#allocation5 + $0x228] sm:$0xff]  ;;  %v2386_v4 = vpack.c.bf16 %v286_v61, %v285_v60  ;;  %v256_v7 = vld [vmem:[#allocation5 + $0x2b8] sm:$0xff] }
  0xc2   :  { %2343 = vmatprep.subr.bf16.mxu1 %v2342_v30  ;;  %v269_v3 = vld [vmem:[#allocation5 + $0x320] sm:$0xff]  ;;  %v270_v5 = vld [vmem:[#allocation5 + $0x328] sm:$0xff]  ;;  %v287_v8 = vld [vmem:[#allocation5 + $0x3b0] sm:$0xff]  ;;  %v2356_v10 = vpack.c.bf16 %v238_v2, %v237_v1  ;;  %v2358_v12 = vpack.c.bf16 %v256_v7, %v255_v6 }
  0xc3   :  { %2313 = vmatpush3.bf16.msra.mxu0 %v2312_v36  ;;  %v288_v9 = vld [vmem:[#allocation5 + $0x3b8] sm:$0xff]  ;;  %v2388_v11 = vpack.c.bf16 %v270_v5, %v269_v3  ;;  %v239_v13 = vld [vmem:[#allocation5 + $0x230] sm:$0xff]  ;;  %v257_v18 = vld [vmem:[#allocation5 + $0x2c0] sm:$0xff] }
  0xc4   :  { %2347 = vmatprep.subr.bf16.mxu0 %v2346_v38  ;;  %v240_v14 = vld [vmem:[#allocation5 + $0x238] sm:$0xff]  ;;  %v271_v15 = vld [vmem:[#allocation5 + $0x330] sm:$0xff]  ;;  %v2390_v16 = vpack.c.bf16 %v288_v9, %v287_v8  ;;  %v258_v19 = vld [vmem:[#allocation5 + $0x2c8] sm:$0xff] }
  0xc5   :  { %2345 = vmatpush3.bf16.msra.mxu1 %v2344_v37  ;;  %v272_v17 = vld [vmem:[#allocation5 + $0x338] sm:$0xff]  ;;  %v289_v20 = vld [vmem:[#allocation5 + $0x3c0] sm:$0xff]  ;;  %v290_v21 = vld [vmem:[#allocation5 + $0x3c8] sm:$0xff]  ;;  %v2360_v22 = vpack.c.bf16 %v240_v14, %v239_v13  ;;  %v2362_v26 = vpack.c.bf16 %v258_v19, %v257_v18 }
  0xc6   :  { %2379 = vmatprep.subr.bf16.mxu1 %v2378_v42  ;;  %625 = vmatmul.mubr.f32.vlgmr.msra.gmra.mrb[0].mxu0 %v145_v48  ;;  %v241_v23 = vld [vmem:[#allocation5 + $0x240] sm:$0xff]  ;;  %v150_v24 = vld [vmem:[#allocation2 + $0x28] sm:$0xff]  ;;  %v2392_v25 = vpack.c.bf16 %v272_v17, %v271_v15  ;;  %v152_v29 = vld [vmem:[#allocation2 + $0x38] sm:$0xff]  ;;  %v2394_v30 = vpack.c.bf16 %v290_v21, %v289_v20 }
  0xc7   :  { %2349 = vmatpush3.bf16.msra.mxu0 %v2348_v49  ;;  %v242_v27 = vld [vmem:[#allocation5 + $0x248] sm:$0xff]  ;;  %v273_v28 = vld [vmem:[#allocation5 + $0x340] sm:$0xff]  ;;  %v259_v32 = vld [vmem:[#allocation5 + $0x2d0] sm:$0xff]  ;;  %764 = vmatprep.mubr.f32.mxu0 %v150_v24 }
  0xc8   :  { %695 = vmatmul.mubr.f32.vlgmr.msra.gmra.mrb[0].mxu1 %v147_v50  ;;  %2351 = vmatprep.subr.bf16.mxu0 %v2350_v52  ;;  %v274_v31 = vld [vmem:[#allocation5 + $0x348] sm:$0xff]  ;;  %v260_v33 = vld [vmem:[#allocation5 + $0x2d8] sm:$0xff]  ;;  %v291_v34 = vld [vmem:[#allocation5 + $0x3d0] sm:$0xff]  ;;  %v2364_v36 = vpack.c.bf16 %v242_v27, %v241_v23 }
  0xc9   :  { %2381 = vmatpush3.bf16.msra.mxu1 %v2380_v51  ;;  %v292_v35 = vld [vmem:[#allocation5 + $0x3d8] sm:$0xff]  ;;  %834 = vmatprep.mubr.f32.mxu1 %v152_v29  ;;  %v2396_v37 = vpack.c.bf16 %v274_v31, %v273_v28  ;;  %v2366_v38 = vpack.c.bf16 %v260_v33, %v259_v32  ;;  %v243_v39 = vld [vmem:[#allocation5 + $0x250] sm:$0xff]  ;;  %v261_v44 = vld [vmem:[#allocation5 + $0x2e0] sm:$0xff] }
  0xca   :  { %2383 = vmatprep.subr.bf16.mxu1 %v2382_v56  ;;  %v244_v40 = vld [vmem:[#allocation5 + $0x258] sm:$0xff]  ;;  %v275_v41 = vld [vmem:[#allocation5 + $0x350] sm:$0xff]  ;;  %v2398_v42 = vpack.c.bf16 %v292_v35, %v291_v34  ;;  %v262_v45 = vld [vmem:[#allocation5 + $0x2e8] sm:$0xff] }
  0xcb   :  { %2353 = vmatpush3.bf16.msra.mxu0 %v2352_v62  ;;  %v276_v43 = vld [vmem:[#allocation5 + $0x358] sm:$0xff]  ;;  %v293_v46 = vld [vmem:[#allocation5 + $0x3e0] sm:$0xff]  ;;  %v294_v47 = vld [vmem:[#allocation5 + $0x3e8] sm:$0xff]  ;;  %v2368_v48 = vpack.c.bf16 %v244_v40, %v243_v39  ;;  %v2370_v50 = vpack.c.bf16 %v262_v45, %v261_v44 }
  0xcc   :  { %2355 = vmatprep.subr.bf16.mxu0 %v2354_v0  ;;  %v2400_v49 = vpack.c.bf16 %v276_v43, %v275_v41  ;;  %v245_v51 = vld [vmem:[#allocation5 + $0x260] sm:$0xff]  ;;  %v246_v52 = vld [vmem:[#allocation5 + $0x268] sm:$0xff]  ;;  %v2402_v54 = vpack.c.bf16 %v294_v47, %v293_v46  ;;  %v263_v56 = vld [vmem:[#allocation5 + $0x2f0] sm:$0xff] }
  0xcd   :  { %2385 = vmatpush3.bf16.msra.mxu1 %v2384_v63  ;;  %v277_v53 = vld [vmem:[#allocation5 + $0x360] sm:$0xff]  ;;  %v278_v55 = vld [vmem:[#allocation5 + $0x368] sm:$0xff]  ;;  %v264_v57 = vld [vmem:[#allocation5 + $0x2f8] sm:$0xff]  ;;  %v2372_v60 = vpack.c.bf16 %v246_v52, %v245_v51 }
  0xce   :  { %2387 = vmatprep.subr.bf16.mxu1 %v2386_v4  ;;  %v295_v58 = vld [vmem:[#allocation5 + $0x3f0] sm:$0xff]  ;;  %v296_v59 = vld [vmem:[#allocation5 + $0x3f8] sm:$0xff]  ;;  %v2404_v61 = vpack.c.bf16 %v278_v55, %v277_v53  ;;  %v2374_v62 = vpack.c.bf16 %v264_v57, %v263_v56  ;;  %v313_v4 = vld [vmem:[#allocation5 + $0x480] sm:$0xff] }
  0xcf   :  { %2357 = vmatpush3.bf16.msra.mxu0 %v2356_v10  ;;  %v247_v63 = vld [vmem:[#allocation5 + $0x270] sm:$0xff]  ;;  %v248_v0 = vld [vmem:[#allocation5 + $0x278] sm:$0xff]  ;;  %v2406_v2 = vpack.c.bf16 %v296_v59, %v295_v58  ;;  %v314_v5 = vld [vmem:[#allocation5 + $0x488] sm:$0xff] }
  0xd0   :  { %2359 = vmatprep.subr.bf16.mxu0 %v2358_v12  ;;  %v279_v1 = vld [vmem:[#allocation5 + $0x370] sm:$0xff]  ;;  %v280_v3 = vld [vmem:[#allocation5 + $0x378] sm:$0xff]  ;;  %v345_v6 = vld [vmem:[#allocation5 + $0x580] sm:$0xff]  ;;  %v2376_v8 = vpack.c.bf16 %v248_v0, %v247_v63  ;;  %v2410_v10 = vpack.c.bf16 %v314_v5, %v313_v4 }
  0xd1   :  { %2389 = vmatpush3.bf16.msra.mxu1 %v2388_v11  ;;  %v346_v7 = vld [vmem:[#allocation5 + $0x588] sm:$0xff]  ;;  %v2408_v9 = vpack.c.bf16 %v280_v3, %v279_v1  ;;  %v297_v11 = vld [vmem:[#allocation5 + $0x400] sm:$0xff]  ;;  %v316_v17 = vld [vmem:[#allocation5 + $0x498] sm:$0xff] }
  0xd2   :  { %2391 = vmatprep.subr.bf16.mxu1 %v2390_v16  ;;  %v298_v12 = vld [vmem:[#allocation5 + $0x408] sm:$0xff]  ;;  %v329_v13 = vld [vmem:[#allocation5 + $0x500] sm:$0xff]  ;;  %v2442_v14 = vpack.c.bf16 %v346_v7, %v345_v6  ;;  %v315_v16 = vld [vmem:[#allocation5 + $0x490] sm:$0xff] }
  0xd3   :  { %2361 = vmatpush3.bf16.msra.mxu0 %v2360_v22  ;;  %v330_v15 = vld [vmem:[#allocation5 + $0x508] sm:$0xff]  ;;  %v347_v18 = vld [vmem:[#allocation5 + $0x590] sm:$0xff]  ;;  %v348_v19 = vld [vmem:[#allocation5 + $0x598] sm:$0xff]  ;;  %v2412_v21 = vpack.c.bf16 %v298_v12, %v297_v11  ;;  %v2414_v24 = vpack.c.bf16 %v316_v17, %v315_v16 }
  0xd4   :  { %2363 = vmatprep.subr.bf16.mxu0 %v2362_v26  ;;  %v149_v20 = vld [vmem:[#allocation2 + $0x20] sm:$0xff]  ;;  %v151_v22 = vld [vmem:[#allocation2 + $0x30] sm:$0xff]  ;;  %v2444_v23 = vpack.c.bf16 %v330_v15, %v329_v13  ;;  %v300_v26 = vld [vmem:[#allocation5 + $0x418] sm:$0xff]  ;;  %v2446_v28 = vpack.c.bf16 %v348_v19, %v347_v18 }
  0xd5   :  { %2393 = vmatpush3.bf16.msra.mxu1 %v2392_v25  ;;  %v299_v25 = vld [vmem:[#allocation5 + $0x410] sm:$0xff]  ;;  %v332_v29 = vld [vmem:[#allocation5 + $0x518] sm:$0xff]  ;;  %v318_v31 = vld [vmem:[#allocation5 + $0x4a8] sm:$0xff] }
  0xd6   :  { %2395 = vmatprep.subr.bf16.mxu1 %v2394_v30  ;;  %v331_v27 = vld [vmem:[#allocation5 + $0x510] sm:$0xff]  ;;  %v317_v30 = vld [vmem:[#allocation5 + $0x4a0] sm:$0xff]  ;;  %v350_v33 = vld [vmem:[#allocation5 + $0x5a8] sm:$0xff]  ;;  %v2416_v35 = vpack.c.bf16 %v300_v26, %v299_v25 }
  0xd7   :  { %2365 = vmatpush3.bf16.msra.mxu0 %v2364_v36  ;;  %v349_v32 = vld [vmem:[#allocation5 + $0x5a0] sm:$0xff]  ;;  %v154_v34 = vld [vmem:[#allocation2 + $0x48] sm:$0xff]  ;;  %v156_v36 = vld [vmem:[#allocation2 + $0x58] sm:$0xff] }
  0xd8   :  { %2367 = vmatprep.subr.bf16.mxu0 %v2366_v38  ;;  %v2418_v38 = vpack.c.bf16 %v318_v31, %v317_v30  ;;  %v301_v39 = vld [vmem:[#allocation5 + $0x420] sm:$0xff]  ;;  %v302_v40 = vld [vmem:[#allocation5 + $0x428] sm:$0xff]  ;;  %v319_v44 = vld [vmem:[#allocation5 + $0x4b0] sm:$0xff] }
  0xd9   :  { %2397 = vmatpush3.bf16.msra.mxu1 %v2396_v37  ;;  %v2448_v37 = vpack.c.bf16 %v332_v29, %v331_v27  ;;  %v333_v41 = vld [vmem:[#allocation5 + $0x520] sm:$0xff]  ;;  %v334_v43 = vld [vmem:[#allocation5 + $0x528] sm:$0xff]  ;;  %v320_v45 = vld [vmem:[#allocation5 + $0x4b8] sm:$0xff] }
  0xda   :  { %2399 = vmatprep.subr.bf16.mxu1 %v2398_v42  ;;  %v2450_v42 = vpack.c.bf16 %v350_v33, %v349_v32  ;;  %v351_v46 = vld [vmem:[#allocation5 + $0x5b0] sm:$0xff]  ;;  %v352_v47 = vld [vmem:[#allocation5 + $0x5b8] sm:$0xff]  ;;  %v321_v56 = vld [vmem:[#allocation5 + $0x4c0] sm:$0xff] }
  0xdb   :  { %2369 = vmatpush3.bf16.msra.mxu0 %v2368_v48  ;;  %v2420_v48 = vpack.c.bf16 %v302_v40, %v301_v39  ;;  %v303_v51 = vld [vmem:[#allocation5 + $0x430] sm:$0xff]  ;;  %v304_v52 = vld [vmem:[#allocation5 + $0x438] sm:$0xff]  ;;  %v322_v57 = vld [vmem:[#allocation5 + $0x4c8] sm:$0xff] }
  0xdc   :  { %2371 = vmatprep.subr.bf16.mxu0 %v2370_v50  ;;  %v2422_v50 = vpack.c.bf16 %v320_v45, %v319_v44  ;;  %v335_v53 = vld [vmem:[#allocation5 + $0x530] sm:$0xff]  ;;  %v336_v55 = vld [vmem:[#allocation5 + $0x538] sm:$0xff]  ;;  %v353_v58 = vld [vmem:[#allocation5 + $0x5c0] sm:$0xff] }
  0xdd   :  { %2401 = vmatpush3.bf16.msra.mxu1 %v2400_v49  ;;  %v2452_v49 = vpack.c.bf16 %v334_v43, %v333_v41  ;;  %v354_v59 = vld [vmem:[#allocation5 + $0x5c8] sm:$0xff]  ;;  %v305_v63 = vld [vmem:[#allocation5 + $0x440] sm:$0xff]  ;;  %v323_v4 = vld [vmem:[#allocation5 + $0x4d0] sm:$0xff] }
  0xde   :  { %2403 = vmatprep.subr.bf16.mxu1 %v2402_v54  ;;  %v2454_v54 = vpack.c.bf16 %v352_v47, %v351_v46  ;;  %v306_v0 = vld [vmem:[#allocation5 + $0x448] sm:$0xff]  ;;  %v337_v1 = vld [vmem:[#allocation5 + $0x540] sm:$0xff]  ;;  %v324_v5 = vld [vmem:[#allocation5 + $0x4d8] sm:$0xff] }
  0xdf   :  { %2373 = vmatpush3.bf16.msra.mxu0 %v2372_v60  ;;  %v2424_v60 = vpack.c.bf16 %v304_v52, %v303_v51  ;;  %v338_v3 = vld [vmem:[#allocation5 + $0x548] sm:$0xff]  ;;  %v355_v6 = vld [vmem:[#allocation5 + $0x5d0] sm:$0xff]  ;;  %v356_v7 = vld [vmem:[#allocation5 + $0x5d8] sm:$0xff] }
  0xe0   :  { %2375 = vmatprep.subr.bf16.mxu0 %v2374_v62  ;;  %v2426_v62 = vpack.c.bf16 %v322_v57, %v321_v56  ;;  %v307_v11 = vld [vmem:[#allocation5 + $0x450] sm:$0xff]  ;;  %v308_v12 = vld [vmem:[#allocation5 + $0x458] sm:$0xff]  ;;  %v325_v16 = vld [vmem:[#allocation5 + $0x4e0] sm:$0xff] }
  0xe1   :  { %2405 = vmatpush3.bf16.msra.mxu1 %v2404_v61  ;;  %v2456_v61 = vpack.c.bf16 %v336_v55, %v335_v53  ;;  %v339_v13 = vld [vmem:[#allocation5 + $0x550] sm:$0xff]  ;;  %v340_v15 = vld [vmem:[#allocation5 + $0x558] sm:$0xff]  ;;  %v326_v17 = vld [vmem:[#allocation5 + $0x4e8] sm:$0xff] }
  0xe2   :  { %2407 = vmatprep.subr.bf16.mxu1 %v2406_v2  ;;  %v2458_v2 = vpack.c.bf16 %v354_v59, %v353_v58  ;;  %v357_v18 = vld [vmem:[#allocation5 + $0x5e0] sm:$0xff]  ;;  %v358_v19 = vld [vmem:[#allocation5 + $0x5e8] sm:$0xff]  ;;  %v328_v29 = vld [vmem:[#allocation5 + $0x4f8] sm:$0xff] }
  0xe3   :  { %2377 = vmatpush3.bf16.msra.mxu0 %v2376_v8  ;;  %v2428_v8 = vpack.c.bf16 %v306_v0, %v305_v63  ;;  %v341_v25 = vld [vmem:[#allocation5 + $0x560] sm:$0xff]  ;;  %v2466_v26 = vpack.c.bf16 %v358_v19, %v357_v18  ;;  %v342_v27 = vld [vmem:[#allocation5 + $0x568] sm:$0xff]  ;;  %v359_v30 = vld [vmem:[#allocation5 + $0x5f0] sm:$0xff] }
  0xe4   :  { %2411 = vmatprep.subr.bf16.mxu0 %v2410_v10  ;;  %v2430_v10 = vpack.c.bf16 %v324_v5, %v323_v4  ;;  %v360_v31 = vld [vmem:[#allocation5 + $0x5f8] sm:$0xff]  ;;  %v2468_v33 = vpack.c.bf16 %v342_v27, %v341_v25  ;;  %v377_v40 = vld [vmem:[#allocation5 + $0x680] sm:$0xff]  ;;  %v378_v41 = vld [vmem:[#allocation5 + $0x688] sm:$0xff] }
  0xe5   :  { %2409 = vmatpush3.bf16.msra.mxu1 %v2408_v9  ;;  %v2460_v9 = vpack.c.bf16 %v338_v3, %v337_v1  ;;  %v344_v39 = vld [vmem:[#allocation5 + $0x578] sm:$0xff]  ;;  %v410_v43 = vld [vmem:[#allocation5 + $0x788] sm:$0xff]  ;;  %v2474_v46 = vpack.c.bf16 %v378_v41, %v377_v40  ;;  %v361_v47 = vld [vmem:[#allocation5 + $0x600] sm:$0xff] }
  0xe6   :  { %2443 = vmatprep.subr.bf16.mxu1 %v2442_v14  ;;  %765 = vmatmul.mubr.f32.vlgmr.msra.gmra.mrb[2].mxu0 %v149_v20  ;;  %v2462_v14 = vpack.c.bf16 %v356_v7, %v355_v6  ;;  %v2432_v20 = vpack.c.bf16 %v308_v12, %v307_v11  ;;  %v394_v51 = vld [vmem:[#allocation5 + $0x708] sm:$0xff]  ;;  %v379_v52 = vld [vmem:[#allocation5 + $0x690] sm:$0xff]  ;;  %v380_v53 = vld [vmem:[#allocation5 + $0x698] sm:$0xff] }
  0xe7   :  { %2413 = vmatpush3.bf16.msra.mxu0 %v2412_v21  ;;  %904 = vmatprep.mubr.f32.mxu0 %v154_v34  ;;  %v2464_v21 = vpack.c.bf16 %v340_v15, %v339_v13  ;;  %v412_v55 = vld [vmem:[#allocation5 + $0x798] sm:$0xff]  ;;  %v153_v56 = vld [vmem:[#allocation2 + $0x40] sm:$0xff]  ;;  %v155_v58 = vld [vmem:[#allocation2 + $0x50] sm:$0xff] }
  0xe8   :  { %835 = vmatmul.mubr.f32.vlgmr.msra.gmra.mrb[2].mxu1 %v151_v22  ;;  %2415 = vmatprep.subr.bf16.mxu0 %v2414_v24  ;;  %v2434_v22 = vpack.c.bf16 %v326_v17, %v325_v16  ;;  %v310_v24 = vld [vmem:[#allocation5 + $0x468] sm:$0xff]  ;;  %v395_v63 = vld [vmem:[#allocation5 + $0x710] sm:$0xff]  ;;  %v396_v1 = vld [vmem:[#allocation5 + $0x718] sm:$0xff] }
  0xe9   :  { %2445 = vmatpush3.bf16.msra.mxu1 %v2444_v23  ;;  %974 = vmatprep.mubr.f32.mxu1 %v156_v36  ;;  %v309_v23 = vld [vmem:[#allocation5 + $0x460] sm:$0xff]  ;;  %v312_v36 = vld [vmem:[#allocation5 + $0x478] sm:$0xff]  ;;  %v382_v3 = vld [vmem:[#allocation5 + $0x6a8] sm:$0xff] }
  0xea   :  { %2447 = vmatprep.subr.bf16.mxu1 %v2446_v28  ;;  %v327_v28 = vld [vmem:[#allocation5 + $0x4f0] sm:$0xff]  ;;  %v2436_v32 = vpack.c.bf16 %v310_v24, %v309_v23  ;;  %v413_v4 = vld [vmem:[#allocation5 + $0x7a0] sm:$0xff]  ;;  %v414_v5 = vld [vmem:[#allocation5 + $0x7a8] sm:$0xff] }
  0xeb   :  { %2417 = vmatpush3.bf16.msra.mxu0 %v2416_v35  ;;  %v2438_v34 = vpack.c.bf16 %v328_v29, %v327_v28  ;;  %v311_v35 = vld [vmem:[#allocation5 + $0x470] sm:$0xff]  ;;  %v158_v6 = vld [vmem:[#allocation2 + $0x68] sm:$0xff]  ;;  %v365_v11 = vld [vmem:[#allocation5 + $0x620] sm:$0xff] }
  0xec   :  { %2419 = vmatprep.subr.bf16.mxu0 %v2418_v38  ;;  %v2470_v38 = vpack.c.bf16 %v360_v31, %v359_v30  ;;  %v2440_v44 = vpack.c.bf16 %v312_v36, %v311_v35  ;;  %v366_v12 = vld [vmem:[#allocation5 + $0x628] sm:$0xff]  ;;  %v397_v13 = vld [vmem:[#allocation5 + $0x720] sm:$0xff]  ;;  %v383_v16 = vld [vmem:[#allocation5 + $0x6b0] sm:$0xff] }
  0xed   :  { %2449 = vmatpush3.bf16.msra.mxu1 %v2448_v37  ;;  %v343_v37 = vld [vmem:[#allocation5 + $0x570] sm:$0xff]  ;;  %v398_v15 = vld [vmem:[#allocation5 + $0x728] sm:$0xff]  ;;  %v384_v17 = vld [vmem:[#allocation5 + $0x6b8] sm:$0xff] }
  0xee   :  { %2451 = vmatprep.subr.bf16.mxu1 %v2450_v42  ;;  %v409_v42 = vld [vmem:[#allocation5 + $0x780] sm:$0xff]  ;;  %v2472_v45 = vpack.c.bf16 %v344_v39, %v343_v37  ;;  %v415_v18 = vld [vmem:[#allocation5 + $0x7b0] sm:$0xff]  ;;  %v416_v19 = vld [vmem:[#allocation5 + $0x7b8] sm:$0xff] }
  0xef   :  { %2421 = vmatpush3.bf16.msra.mxu0 %v2420_v48  ;;  %v362_v48 = vld [vmem:[#allocation5 + $0x608] sm:$0xff]  ;;  %v367_v23 = vld [vmem:[#allocation5 + $0x630] sm:$0xff]  ;;  %v368_v24 = vld [vmem:[#allocation5 + $0x638] sm:$0xff] }
  0xf0   :  { %2423 = vmatprep.subr.bf16.mxu0 %v2422_v50  ;;  %v2506_v50 = vpack.c.bf16 %v410_v43, %v409_v42  ;;  %v2476_v57 = vpack.c.bf16 %v362_v48, %v361_v47  ;;  %v399_v25 = vld [vmem:[#allocation5 + $0x730] sm:$0xff]  ;;  %v400_v27 = vld [vmem:[#allocation5 + $0x738] sm:$0xff]  ;;  %v385_v28 = vld [vmem:[#allocation5 + $0x6c0] sm:$0xff] }
  0xf1   :  { %2453 = vmatpush3.bf16.msra.mxu1 %v2452_v49  ;;  %v393_v49 = vld [vmem:[#allocation5 + $0x700] sm:$0xff]  ;;  %v386_v29 = vld [vmem:[#allocation5 + $0x6c8] sm:$0xff]  ;;  %v387_v40 = vld [vmem:[#allocation5 + $0x6d0] sm:$0xff] }
  0xf2   :  { %2455 = vmatprep.subr.bf16.mxu1 %v2454_v54  ;;  %v411_v54 = vld [vmem:[#allocation5 + $0x790] sm:$0xff]  ;;  %v2508_v59 = vpack.c.bf16 %v394_v51, %v393_v49  ;;  %v417_v30 = vld [vmem:[#allocation5 + $0x7c0] sm:$0xff]  ;;  %v418_v31 = vld [vmem:[#allocation5 + $0x7c8] sm:$0xff] }
  0xf3   :  { %2425 = vmatpush3.bf16.msra.mxu0 %v2424_v60  ;;  %v2478_v60 = vpack.c.bf16 %v380_v53, %v379_v52  ;;  %v2510_v0 = vpack.c.bf16 %v412_v55, %v411_v54  ;;  %v369_v35 = vld [vmem:[#allocation5 + $0x640] sm:$0xff]  ;;  %v370_v36 = vld [vmem:[#allocation5 + $0x648] sm:$0xff]  ;;  %v388_v41 = vld [vmem:[#allocation5 + $0x6d8] sm:$0xff] }
  0xf4   :  { %2427 = vmatprep.subr.bf16.mxu0 %v2426_v62  ;;  %v364_v62 = vld [vmem:[#allocation5 + $0x618] sm:$0xff]  ;;  %v401_v37 = vld [vmem:[#allocation5 + $0x740] sm:$0xff]  ;;  %v402_v39 = vld [vmem:[#allocation5 + $0x748] sm:$0xff] }
  0xf5   :  { %2457 = vmatpush3.bf16.msra.mxu1 %v2456_v61  ;;  %v363_v61 = vld [vmem:[#allocation5 + $0x610] sm:$0xff]  ;;  %v420_v43 = vld [vmem:[#allocation5 + $0x7d8] sm:$0xff]  ;;  %v389_v52 = vld [vmem:[#allocation5 + $0x6e0] sm:$0xff] }
  0xf6   :  { %2459 = vmatprep.subr.bf16.mxu1 %v2458_v2  ;;  %v381_v2 = vld [vmem:[#allocation5 + $0x6a0] sm:$0xff]  ;;  %v2480_v7 = vpack.c.bf16 %v364_v62, %v363_v61  ;;  %v419_v42 = vld [vmem:[#allocation5 + $0x7d0] sm:$0xff]  ;;  %v372_v48 = vld [vmem:[#allocation5 + $0x658] sm:$0xff] }
  0xf7   :  { %2429 = vmatpush3.bf16.msra.mxu0 %v2428_v8  ;;  %v160_v8 = vld [vmem:[#allocation2 + $0x78] sm:$0xff]  ;;  %v371_v47 = vld [vmem:[#allocation5 + $0x650] sm:$0xff]  ;;  %v390_v53 = vld [vmem:[#allocation5 + $0x6e8] sm:$0xff] }
  0xf8   :  { %2431 = vmatprep.subr.bf16.mxu0 %v2430_v10  ;;  %v2482_v10 = vpack.c.bf16 %v382_v3, %v381_v2  ;;  %v403_v49 = vld [vmem:[#allocation5 + $0x750] sm:$0xff]  ;;  %v404_v51 = vld [vmem:[#allocation5 + $0x758] sm:$0xff]  ;;  %v421_v54 = vld [vmem:[#allocation5 + $0x7e0] sm:$0xff] }
  0xf9   :  { %2461 = vmatpush3.bf16.msra.mxu1 %v2460_v9  ;;  %v2512_v9 = vpack.c.bf16 %v396_v1, %v395_v63  ;;  %v422_v55 = vld [vmem:[#allocation5 + $0x7e8] sm:$0xff]  ;;  %v405_v61 = vld [vmem:[#allocation5 + $0x760] sm:$0xff]  ;;  %v392_v1 = vld [vmem:[#allocation5 + $0x6f8] sm:$0xff] }
  0xfa   :  { %2463 = vmatprep.subr.bf16.mxu1 %v2462_v14  ;;  %v2514_v14 = vpack.c.bf16 %v414_v5, %v413_v4  ;;  %v2530_v62 = vpack.c.bf16 %v422_v55, %v421_v54  ;;  %v406_v63 = vld [vmem:[#allocation5 + $0x768] sm:$0xff]  ;;  %v423_v2 = vld [vmem:[#allocation5 + $0x7f0] sm:$0xff]  ;;  %v424_v3 = vld [vmem:[#allocation5 + $0x7f8] sm:$0xff] }
  0xfb   :  { %2433 = vmatpush3.bf16.msra.mxu0 %v2432_v20  ;;  %v2484_v20 = vpack.c.bf16 %v366_v12, %v365_v11  ;;  %v2532_v5 = vpack.c.bf16 %v406_v63, %v405_v61  ;;  %v408_v11 = vld [vmem:[#allocation5 + $0x778] sm:$0xff]  ;;  %v441_v12 = vld [vmem:[#allocation5 + $0x880] sm:$0xff]  ;;  %v479_v54 = vld [vmem:[#allocation5 + $0x9b0] sm:$0xff] }
  0xfc   :  { %2435 = vmatprep.subr.bf16.mxu0 %v2434_v22  ;;  %v2486_v22 = vpack.c.bf16 %v384_v17, %v383_v16  ;;  %v480_v55 = vld [vmem:[#allocation5 + $0x9b8] sm:$0xff]  ;;  %v463_v61 = vld [vmem:[#allocation5 + $0x930] sm:$0xff] }
  0xfd   :  { %2465 = vmatpush3.bf16.msra.mxu1 %v2464_v21  ;;  %v2516_v21 = vpack.c.bf16 %v398_v15, %v397_v13  ;;  %v442_v13 = vld [vmem:[#allocation5 + $0x888] sm:$0xff]  ;;  %v464_v63 = vld [vmem:[#allocation5 + $0x938] sm:$0xff] }
  0xfe   :  { %2467 = vmatprep.subr.bf16.mxu1 %v2466_v26  ;;  %v2518_v26 = vpack.c.bf16 %v416_v19, %v415_v18  ;;  %v474_v15 = vld [vmem:[#allocation5 + $0x988] sm:$0xff]  ;;  %v2538_v18 = vpack.c.bf16 %v442_v13, %v441_v12  ;;  %v425_v19 = vld [vmem:[#allocation5 + $0x800] sm:$0xff]  ;;  %v451_v12 = vld [vmem:[#allocation5 + $0x8d0] sm:$0xff] }
  0xff   :  { %2437 = vmatpush3.bf16.msra.mxu0 %v2436_v32  ;;  %v2488_v32 = vpack.c.bf16 %v368_v24, %v367_v23  ;;  %v458_v23 = vld [vmem:[#allocation5 + $0x908] sm:$0xff]  ;;  %v443_v24 = vld [vmem:[#allocation5 + $0x890] sm:$0xff]  ;;  %v452_v13 = vld [vmem:[#allocation5 + $0x8d8] sm:$0xff] }
 0x100   :  { %2439 = vmatprep.subr.bf16.mxu0 %v2438_v34  ;;  %v2490_v34 = vpack.c.bf16 %v386_v29, %v385_v28  ;;  %v157_v28 = vld [vmem:[#allocation2 + $0x60] sm:$0xff] }
 0x101   :  { %2469 = vmatpush3.bf16.msra.mxu1 %v2468_v33  ;;  %v2520_v33 = vpack.c.bf16 %v400_v27, %v399_v25  ;;  %v444_v25 = vld [vmem:[#allocation5 + $0x898] sm:$0xff] }
 0x102   :  { %2471 = vmatprep.subr.bf16.mxu1 %v2470_v38  ;;  %v2522_v38 = vpack.c.bf16 %v418_v31, %v417_v30  ;;  %v476_v27 = vld [vmem:[#allocation5 + $0x998] sm:$0xff]  ;;  %v159_v30 = vld [vmem:[#allocation2 + $0x70] sm:$0xff] }
 0x103   :  { %2441 = vmatpush3.bf16.msra.mxu0 %v2440_v44  ;;  %v2492_v44 = vpack.c.bf16 %v370_v36, %v369_v35  ;;  %v459_v35 = vld [vmem:[#allocation5 + $0x910] sm:$0xff] }
 0x104   :  { %2475 = vmatprep.subr.bf16.mxu0 %v2474_v46  ;;  %v2494_v46 = vpack.c.bf16 %v388_v41, %v387_v40  ;;  %v477_v40 = vld [vmem:[#allocation5 + $0x9a0] sm:$0xff]  ;;  %v478_v41 = vld [vmem:[#allocation5 + $0x9a8] sm:$0xff] }
 0x105   :  { %2473 = vmatpush3.bf16.msra.mxu1 %v2472_v45  ;;  %v2524_v45 = vpack.c.bf16 %v402_v39, %v401_v37  ;;  %v460_v37 = vld [vmem:[#allocation5 + $0x918] sm:$0xff]  ;;  %v446_v39 = vld [vmem:[#allocation5 + $0x8a8] sm:$0xff] }
 0x106   :  { %2507 = vmatprep.subr.bf16.mxu1 %v2506_v50  ;;  %905 = vmatmul.mubr.f32.vlgmr.msra.gmra.mrb[4].mxu0 %v153_v56  ;;  %v2526_v50 = vpack.c.bf16 %v420_v43, %v419_v42  ;;  %v2496_v56 = vpack.c.bf16 %v372_v48, %v371_v47  ;;  %v162_v42 = vld [vmem:[#allocation2 + $0x88] sm:$0xff]  ;;  %v429_v47 = vld [vmem:[#allocation5 + $0x820] sm:$0xff] }
 0x107   :  { %2477 = vmatpush3.bf16.msra.mxu0 %v2476_v57  ;;  %1044 = vmatprep.mubr.f32.mxu0 %v158_v6  ;;  %v2528_v57 = vpack.c.bf16 %v404_v51, %v403_v49  ;;  %v430_v48 = vld [vmem:[#allocation5 + $0x828] sm:$0xff]  ;;  %v461_v49 = vld [vmem:[#allocation5 + $0x920] sm:$0xff] }
 0x108   :  { %975 = vmatmul.mubr.f32.vlgmr.msra.gmra.mrb[4].mxu1 %v155_v58  ;;  %2479 = vmatprep.subr.bf16.mxu0 %v2478_v60  ;;  %v2498_v58 = vpack.c.bf16 %v390_v53, %v389_v52  ;;  %v374_v60 = vld [vmem:[#allocation5 + $0x668] sm:$0xff]  ;;  %v447_v52 = vld [vmem:[#allocation5 + $0x8b0] sm:$0xff]  ;;  %v448_v53 = vld [vmem:[#allocation5 + $0x8b8] sm:$0xff] }
 0x109   :  { %2509 = vmatpush3.bf16.msra.mxu1 %v2508_v59  ;;  %1114 = vmatprep.mubr.f32.mxu1 %v160_v8  ;;  %v373_v59 = vld [vmem:[#allocation5 + $0x660] sm:$0xff]  ;;  %v376_v8 = vld [vmem:[#allocation5 + $0x678] sm:$0xff]  ;;  %v462_v51 = vld [vmem:[#allocation5 + $0x928] sm:$0xff] }
 0x10a   :  { %2511 = vmatprep.subr.bf16.mxu1 %v2510_v0  ;;  %v391_v0 = vld [vmem:[#allocation5 + $0x6f0] sm:$0xff]  ;;  %v2500_v4 = vpack.c.bf16 %v374_v60, %v373_v59  ;;  %v432_v60 = vld [vmem:[#allocation5 + $0x838] sm:$0xff] }
 0x10b   :  { %2481 = vmatpush3.bf16.msra.mxu0 %v2480_v7  ;;  %v2502_v6 = vpack.c.bf16 %v392_v1, %v391_v0  ;;  %v375_v7 = vld [vmem:[#allocation5 + $0x670] sm:$0xff]  ;;  %v449_v0 = vld [vmem:[#allocation5 + $0x8c0] sm:$0xff]  ;;  %v450_v1 = vld [vmem:[#allocation5 + $0x8c8] sm:$0xff] }
 0x10c   :  { %2483 = vmatprep.subr.bf16.mxu0 %v2482_v10  ;;  %v2534_v10 = vpack.c.bf16 %v424_v3, %v423_v2  ;;  %v2504_v16 = vpack.c.bf16 %v376_v8, %v375_v7  ;;  %v431_v59 = vld [vmem:[#allocation5 + $0x830] sm:$0xff]  ;;  %v481_v2 = vld [vmem:[#allocation5 + $0x9c0] sm:$0xff]  ;;  %v482_v3 = vld [vmem:[#allocation5 + $0x9c8] sm:$0xff] }
 0x10d   :  { %2513 = vmatpush3.bf16.msra.mxu1 %v2512_v9  ;;  %v407_v9 = vld [vmem:[#allocation5 + $0x770] sm:$0xff]  ;;  %v433_v7 = vld [vmem:[#allocation5 + $0x840] sm:$0xff]  ;;  %v434_v8 = vld [vmem:[#allocation5 + $0x848] sm:$0xff] }
 0x10e   :  { %2515 = vmatprep.subr.bf16.mxu1 %v2514_v14  ;;  %v473_v14 = vld [vmem:[#allocation5 + $0x980] sm:$0xff]  ;;  %v2536_v17 = vpack.c.bf16 %v408_v11, %v407_v9  ;;  %v466_v11 = vld [vmem:[#allocation5 + $0x948] sm:$0xff] }
 0x10f   :  { %2485 = vmatpush3.bf16.msra.mxu0 %v2484_v20  ;;  %v426_v20 = vld [vmem:[#allocation5 + $0x808] sm:$0xff]  ;;  %v465_v9 = vld [vmem:[#allocation5 + $0x940] sm:$0xff] }
 0x110   :  { %2487 = vmatprep.subr.bf16.mxu0 %v2486_v22  ;;  %v2570_v22 = vpack.c.bf16 %v474_v15, %v473_v14  ;;  %v2540_v29 = vpack.c.bf16 %v426_v20, %v425_v19  ;;  %v483_v14 = vld [vmem:[#allocation5 + $0x9d0] sm:$0xff]  ;;  %v484_v15 = vld [vmem:[#allocation5 + $0x9d8] sm:$0xff] }
 0x111   :  { %2517 = vmatpush3.bf16.msra.mxu1 %v2516_v21  ;;  %v457_v21 = vld [vmem:[#allocation5 + $0x900] sm:$0xff]  ;;  %v435_v19 = vld [vmem:[#allocation5 + $0x850] sm:$0xff]  ;;  %v436_v20 = vld [vmem:[#allocation5 + $0x858] sm:$0xff] }
 0x112   :  { %2519 = vmatprep.subr.bf16.mxu1 %v2518_v26  ;;  %v475_v26 = vld [vmem:[#allocation5 + $0x990] sm:$0xff]  ;;  %v2572_v31 = vpack.c.bf16 %v458_v23, %v457_v21  ;;  %v468_v23 = vld [vmem:[#allocation5 + $0x958] sm:$0xff] }
 0x113   :  { %2489 = vmatpush3.bf16.msra.mxu0 %v2488_v32  ;;  %v2542_v32 = vpack.c.bf16 %v444_v25, %v443_v24  ;;  %v2574_v36 = vpack.c.bf16 %v476_v27, %v475_v26  ;;  %v467_v21 = vld [vmem:[#allocation5 + $0x950] sm:$0xff]  ;;  %v453_v24 = vld [vmem:[#allocation5 + $0x8e0] sm:$0xff]  ;;  %v454_v25 = vld [vmem:[#allocation5 + $0x8e8] sm:$0xff] }
 0x114   :  { %2491 = vmatprep.subr.bf16.mxu0 %v2490_v34  ;;  %v428_v34 = vld [vmem:[#allocation5 + $0x818] sm:$0xff]  ;;  %v485_v26 = vld [vmem:[#allocation5 + $0x9e0] sm:$0xff]  ;;  %v486_v27 = vld [vmem:[#allocation5 + $0x9e8] sm:$0xff] }
 0x115   :  { %2521 = vmatpush3.bf16.msra.mxu1 %v2520_v33  ;;  %v427_v33 = vld [vmem:[#allocation5 + $0x810] sm:$0xff] }
 0x116   :  { %2523 = vmatprep.subr.bf16.mxu1 %v2522_v38  ;;  %v445_v38 = vld [vmem:[#allocation5 + $0x8a0] sm:$0xff]  ;;  %v2544_v43 = vpack.c.bf16 %v428_v34, %v427_v33  ;;  %v2594_v34 = vpack.c.bf16 %v486_v27, %v485_v26  ;;  %v543_v26 = vld [vmem:[#allocation5 + $0xbb0] sm:$0xff]  ;;  %v544_v27 = vld [vmem:[#allocation5 + $0xbb8] sm:$0xff] }
 0x117   :  { %2493 = vmatpush3.bf16.msra.mxu0 %v2492_v44  ;;  %v164_v44 = vld [vmem:[#allocation2 + $0x98] sm:$0xff]  ;;  %v469_v33 = vld [vmem:[#allocation5 + $0x960] sm:$0xff] }
 0x118   :  { %2495 = vmatprep.subr.bf16.mxu0 %v2494_v46  ;;  %v2546_v46 = vpack.c.bf16 %v446_v39, %v445_v38  ;;  %v487_v38 = vld [vmem:[#allocation5 + $0x9f0] sm:$0xff]  ;;  %v488_v39 = vld [vmem:[#allocation5 + $0x9f8] sm:$0xff] }
 0x119   :  { %2525 = vmatpush3.bf16.msra.mxu1 %v2524_v45  ;;  %v2576_v45 = vpack.c.bf16 %v460_v37, %v459_v35  ;;  %v470_v35 = vld [vmem:[#allocation5 + $0x968] sm:$0xff]  ;;  %v456_v37 = vld [vmem:[#allocation5 + $0x8f8] sm:$0xff] }
 0x11a   :  { %2527 = vmatprep.subr.bf16.mxu1 %v2526_v50  ;;  %v2578_v50 = vpack.c.bf16 %v478_v41, %v477_v40  ;;  %v2596_v41 = vpack.c.bf16 %v470_v35, %v469_v33  ;;  %v527_v33 = vld [vmem:[#allocation5 + $0xb30] sm:$0xff]  ;;  %v528_v35 = vld [vmem:[#allocation5 + $0xb38] sm:$0xff] }
 0x11b   :  { %2497 = vmatpush3.bf16.msra.mxu0 %v2496_v56  ;;  %v2548_v56 = vpack.c.bf16 %v430_v48, %v429_v47  ;;  %v472_v47 = vld [vmem:[#allocation5 + $0x978] sm:$0xff]  ;;  %v505_v48 = vld [vmem:[#allocation5 + $0xa80] sm:$0xff] }
 0x11c   :  { %2499 = vmatprep.subr.bf16.mxu0 %v2498_v58  ;;  %v2550_v58 = vpack.c.bf16 %v448_v53, %v447_v52 }
 0x11d   :  { %2529 = vmatpush3.bf16.msra.mxu1 %v2528_v57  ;;  %v2580_v57 = vpack.c.bf16 %v462_v51, %v461_v49  ;;  %v506_v49 = vld [vmem:[#allocation5 + $0xa88] sm:$0xff] }
 0x11e   :  { %2531 = vmatprep.subr.bf16.mxu1 %v2530_v62  ;;  %v2582_v62 = vpack.c.bf16 %v480_v55, %v479_v54  ;;  %v538_v51 = vld [vmem:[#allocation5 + $0xb88] sm:$0xff]  ;;  %v2602_v54 = vpack.c.bf16 %v506_v49, %v505_v48  ;;  %v489_v55 = vld [vmem:[#allocation5 + $0xa00] sm:$0xff]  ;;  %v515_v48 = vld [vmem:[#allocation5 + $0xad0] sm:$0xff] }
 0x11f   :  { %2501 = vmatpush3.bf16.msra.mxu0 %v2500_v4  ;;  %v2552_v4 = vpack.c.bf16 %v432_v60, %v431_v59  ;;  %v522_v59 = vld [vmem:[#allocation5 + $0xb08] sm:$0xff]  ;;  %v507_v60 = vld [vmem:[#allocation5 + $0xa90] sm:$0xff]  ;;  %v516_v49 = vld [vmem:[#allocation5 + $0xad8] sm:$0xff] }
 0x120   :  { %2503 = vmatprep.subr.bf16.mxu0 %v2502_v6  ;;  %v2554_v6 = vpack.c.bf16 %v450_v1, %v449_v0  ;;  %v161_v0 = vld [vmem:[#allocation2 + $0x80] sm:$0xff] }
 0x121   :  { %2533 = vmatpush3.bf16.msra.mxu1 %v2532_v5  ;;  %v2584_v5 = vpack.c.bf16 %v464_v63, %v463_v61  ;;  %v508_v61 = vld [vmem:[#allocation5 + $0xa98] sm:$0xff] }
 0x122   :  { %2535 = vmatprep.subr.bf16.mxu1 %v2534_v10  ;;  %v2586_v10 = vpack.c.bf16 %v482_v3, %v481_v2  ;;  %v540_v63 = vld [vmem:[#allocation5 + $0xb98] sm:$0xff]  ;;  %v163_v2 = vld [vmem:[#allocation2 + $0x90] sm:$0xff] }
 0x123   :  { %2505 = vmatpush3.bf16.msra.mxu0 %v2504_v16  ;;  %v2556_v16 = vpack.c.bf16 %v434_v8, %v433_v7  ;;  %v523_v7 = vld [vmem:[#allocation5 + $0xb10] sm:$0xff] }
 0x124   :  { %2539 = vmatprep.subr.bf16.mxu0 %v2538_v18  ;;  %v2558_v18 = vpack.c.bf16 %v452_v13, %v451_v12  ;;  %v541_v12 = vld [vmem:[#allocation5 + $0xba0] sm:$0xff]  ;;  %v542_v13 = vld [vmem:[#allocation5 + $0xba8] sm:$0xff] }
 0x125   :  { %2537 = vmatpush3.bf16.msra.mxu1 %v2536_v17  ;;  %v2588_v17 = vpack.c.bf16 %v466_v11, %v465_v9  ;;  %v524_v9 = vld [vmem:[#allocation5 + $0xb18] sm:$0xff]  ;;  %v510_v11 = vld [vmem:[#allocation5 + $0xaa8] sm:$0xff] }
 0x126   :  { %2571 = vmatprep.subr.bf16.mxu1 %v2570_v22  ;;  %1045 = vmatmul.mubr.f32.vlgmr.msra.gmra.mrb[6].mxu0 %v157_v28  ;;  %v2590_v22 = vpack.c.bf16 %v484_v15, %v483_v14  ;;  %v2560_v28 = vpack.c.bf16 %v436_v20, %v435_v19  ;;  %v166_v14 = vld [vmem:[#allocation2 + $0xa8] sm:$0xff]  ;;  %v493_v19 = vld [vmem:[#allocation5 + $0xa20] sm:$0xff] }
 0x127   :  { %2541 = vmatpush3.bf16.msra.mxu0 %v2540_v29  ;;  %1184 = vmatprep.mubr.f32.mxu0 %v162_v42  ;;  %v2592_v29 = vpack.c.bf16 %v468_v23, %v467_v21  ;;  %v494_v20 = vld [vmem:[#allocation5 + $0xa28] sm:$0xff]  ;;  %v525_v21 = vld [vmem:[#allocation5 + $0xb20] sm:$0xff] }
 0x128   :  { %1115 = vmatmul.mubr.f32.vlgmr.msra.gmra.mrb[6].mxu1 %v159_v30  ;;  %2543 = vmatprep.subr.bf16.mxu0 %v2542_v32  ;;  %v2562_v30 = vpack.c.bf16 %v454_v25, %v453_v24  ;;  %v438_v32 = vld [vmem:[#allocation5 + $0x868] sm:$0xff]  ;;  %v511_v24 = vld [vmem:[#allocation5 + $0xab0] sm:$0xff]  ;;  %v512_v25 = vld [vmem:[#allocation5 + $0xab8] sm:$0xff] }
 0x129   :  { %2573 = vmatpush3.bf16.msra.mxu1 %v2572_v31  ;;  %1254 = vmatprep.mubr.f32.mxu1 %v164_v44  ;;  %v437_v31 = vld [vmem:[#allocation5 + $0x860] sm:$0xff]  ;;  %v440_v44 = vld [vmem:[#allocation5 + $0x878] sm:$0xff]  ;;  %v526_v23 = vld [vmem:[#allocation5 + $0xb28] sm:$0xff] }
 0x12a   :  { %2575 = vmatprep.subr.bf16.mxu1 %v2574_v36  ;;  %v455_v36 = vld [vmem:[#allocation5 + $0x8f0] sm:$0xff]  ;;  %v2564_v40 = vpack.c.bf16 %v438_v32, %v437_v31  ;;  %v496_v32 = vld [vmem:[#allocation5 + $0xa38] sm:$0xff] }
 0x12b   :  { %2545 = vmatpush3.bf16.msra.mxu0 %v2544_v43  ;;  %v2566_v42 = vpack.c.bf16 %v456_v37, %v455_v36  ;;  %v439_v43 = vld [vmem:[#allocation5 + $0x870] sm:$0xff]  ;;  %v513_v36 = vld [vmem:[#allocation5 + $0xac0] sm:$0xff]  ;;  %v514_v37 = vld [vmem:[#allocation5 + $0xac8] sm:$0xff] }
 0x12c   :  { %2547 = vmatprep.subr.bf16.mxu0 %v2546_v46  ;;  %v2598_v46 = vpack.c.bf16 %v488_v39, %v487_v38  ;;  %v2568_v52 = vpack.c.bf16 %v440_v44, %v439_v43  ;;  %v495_v31 = vld [vmem:[#allocation5 + $0xa30] sm:$0xff]  ;;  %v545_v38 = vld [vmem:[#allocation5 + $0xbc0] sm:$0xff]  ;;  %v546_v39 = vld [vmem:[#allocation5 + $0xbc8] sm:$0xff] }
 0x12d   :  { %2577 = vmatpush3.bf16.msra.mxu1 %v2576_v45  ;;  %v471_v45 = vld [vmem:[#allocation5 + $0x970] sm:$0xff]  ;;  %v497_v43 = vld [vmem:[#allocation5 + $0xa40] sm:$0xff]  ;;  %v498_v44 = vld [vmem:[#allocation5 + $0xa48] sm:$0xff] }
 0x12e   :  { %2579 = vmatprep.subr.bf16.mxu1 %v2578_v50  ;;  %v537_v50 = vld [vmem:[#allocation5 + $0xb80] sm:$0xff]  ;;  %v2600_v53 = vpack.c.bf16 %v472_v47, %v471_v45  ;;  %v530_v47 = vld [vmem:[#allocation5 + $0xb48] sm:$0xff] }
 0x12f   :  { %2549 = vmatpush3.bf16.msra.mxu0 %v2548_v56  ;;  %v490_v56 = vld [vmem:[#allocation5 + $0xa08] sm:$0xff]  ;;  %v529_v45 = vld [vmem:[#allocation5 + $0xb40] sm:$0xff] }
 0x130   :  { %2551 = vmatprep.subr.bf16.mxu0 %v2550_v58  ;;  %v2634_v58 = vpack.c.bf16 %v538_v51, %v537_v50  ;;  %v2604_v1 = vpack.c.bf16 %v490_v56, %v489_v55  ;;  %v547_v50 = vld [vmem:[#allocation5 + $0xbd0] sm:$0xff]  ;;  %v548_v51 = vld [vmem:[#allocation5 + $0xbd8] sm:$0xff] }
 0x131   :  { %2581 = vmatpush3.bf16.msra.mxu1 %v2580_v57  ;;  %v521_v57 = vld [vmem:[#allocation5 + $0xb00] sm:$0xff]  ;;  %v499_v55 = vld [vmem:[#allocation5 + $0xa50] sm:$0xff]  ;;  %v500_v56 = vld [vmem:[#allocation5 + $0xa58] sm:$0xff] }
 0x132   :  { %2583 = vmatprep.subr.bf16.mxu1 %v2582_v62  ;;  %v539_v62 = vld [vmem:[#allocation5 + $0xb90] sm:$0xff]  ;;  %v2636_v3 = vpack.c.bf16 %v522_v59, %v521_v57  ;;  %v532_v59 = vld [vmem:[#allocation5 + $0xb58] sm:$0xff] }
 0x133   :  { %2553 = vmatpush3.bf16.msra.mxu0 %v2552_v4  ;;  %v2606_v4 = vpack.c.bf16 %v508_v61, %v507_v60  ;;  %v2638_v8 = vpack.c.bf16 %v540_v63, %v539_v62  ;;  %v531_v57 = vld [vmem:[#allocation5 + $0xb50] sm:$0xff]  ;;  %v517_v60 = vld [vmem:[#allocation5 + $0xae0] sm:$0xff]  ;;  %v518_v61 = vld [vmem:[#allocation5 + $0xae8] sm:$0xff] }
 0x134   :  { %2555 = vmatprep.subr.bf16.mxu0 %v2554_v6  ;;  %v492_v6 = vld [vmem:[#allocation5 + $0xa18] sm:$0xff]  ;;  %v549_v62 = vld [vmem:[#allocation5 + $0xbe0] sm:$0xff]  ;;  %v550_v63 = vld [vmem:[#allocation5 + $0xbe8] sm:$0xff] }
 0x135   :  { %2585 = vmatpush3.bf16.msra.mxu1 %v2584_v5  ;;  %v491_v5 = vld [vmem:[#allocation5 + $0xa10] sm:$0xff] }
 0x136   :  { %2587 = vmatprep.subr.bf16.mxu1 %v2586_v10  ;;  %v509_v10 = vld [vmem:[#allocation5 + $0xaa0] sm:$0xff]  ;;  %v2608_v15 = vpack.c.bf16 %v492_v6, %v491_v5  ;;  %v2658_v6 = vpack.c.bf16 %v550_v63, %v549_v62  ;;  %v1415_v62 = vld [vmem:[#allocation8 + $0x70] sm:$0xff] }
 0x137   :  { %2557 = vmatpush3.bf16.msra.mxu0 %v2556_v16  ;;  %v168_v16 = vld [vmem:[#allocation2 + $0xb8] sm:$0xff]  ;;  %v533_v5 = vld [vmem:[#allocation5 + $0xb60] sm:$0xff] }
 0x138   :  { %2559 = vmatprep.subr.bf16.mxu0 %v2558_v18  ;;  %v2610_v18 = vpack.c.bf16 %v510_v11, %v509_v10  ;;  %v551_v10 = vld [vmem:[#allocation5 + $0xbf0] sm:$0xff]  ;;  %v552_v11 = vld [vmem:[#allocation5 + $0xbf8] sm:$0xff] }
 0x139   :  { %2589 = vmatpush3.bf16.msra.mxu1 %v2588_v17  ;;  %v2640_v17 = vpack.c.bf16 %v524_v9, %v523_v7  ;;  %v534_v7 = vld [vmem:[#allocation5 + $0xb68] sm:$0xff]  ;;  %v520_v9 = vld [vmem:[#allocation5 + $0xaf8] sm:$0xff] }
 0x13a   :  { %2591 = vmatprep.subr.bf16.mxu1 %v2590_v22  ;;  %v2642_v22 = vpack.c.bf16 %v542_v13, %v541_v12  ;;  %v2660_v13 = vpack.c.bf16 %v534_v7, %v533_v5  ;;  %v1416_v63 = vld [vmem:[#allocation8 + $0x78] sm:$0xff] }
 0x13b   :  { %2561 = vmatpush3.bf16.msra.mxu0 %v2560_v28  ;;  %v2612_v28 = vpack.c.bf16 %v494_v20, %v493_v19  ;;  %v536_v19 = vld [vmem:[#allocation5 + $0xb78] sm:$0xff] }
 0x13c   :  { %2563 = vmatprep.subr.bf16.mxu0 %v2562_v30  ;;  %v2614_v30 = vpack.c.bf16 %v512_v25, %v511_v24  ;;  %v1702_v25 = vld [vmem:[#allocation7] ss:$0 sm:$0xff]  ;;  %v1497_v5 = vld [vmem:[#allocation11 + $0x10] sm:$0xff] }
 0x13d   :  { %2593 = vmatpush3.bf16.msra.mxu1 %v2592_v29  ;;  %v2644_v29 = vpack.c.bf16 %v526_v23, %v525_v21  ;;  %v167_v23 = vld [vmem:[#allocation2 + $0xb0] sm:$0xff]  ;;  %v1498_v7 = vld [vmem:[#allocation11 + $0x18] sm:$0xff] }
 0x13e   :  { %2595 = vmatprep.subr.bf16.mxu1 %v2594_v34  ;;  %v2646_v34 = vpack.c.bf16 %v544_v27, %v543_v26 }
 0x13f   :  { %2565 = vmatpush3.bf16.msra.mxu0 %v2564_v40  ;;  %v2616_v40 = vpack.c.bf16 %v496_v32, %v495_v31 }
 0x140   :  { %2567 = vmatprep.subr.bf16.mxu0 %v2566_v42  ;;  %v2618_v42 = vpack.c.bf16 %v514_v37, %v513_v36  ;;  %v2996_v36 = vmov 0.0|0.0  }
 0x141   :  { %2597 = vmatpush3.bf16.msra.mxu1 %v2596_v41  ;;  %v2648_v41 = vpack.c.bf16 %v528_v35, %v527_v33  ;;  %v1401_v33 = vld [vmem:[#allocation8] sm:$0xff]  ;;  %v1403_v35 = vld [vmem:[#allocation8 + $0x10] sm:$0xff] }
 0x142   :  { %2599 = vmatprep.subr.bf16.mxu1 %v2598_v46  ;;  %v2650_v46 = vpack.c.bf16 %v546_v39, %v545_v38  ;;  %v1404_v38 = vld [vmem:[#allocation8 + $0x18] sm:$0xff] }
 0x143   :  { %2569 = vmatpush3.bf16.msra.mxu0 %v2568_v52  ;;  %v2620_v52 = vpack.c.bf16 %v498_v44, %v497_v43  ;;  %v2670_v39 = vpack.c.bf16 %v1404_v38, %v1403_v35  ;;  %v1407_v43 = vld [vmem:[#allocation8 + $0x30] sm:$0xff]  ;;  %v1408_v44 = vld [vmem:[#allocation8 + $0x38] sm:$0xff] }
 0x144   :  { %2603 = vmatprep.subr.bf16.mxu0 %v2602_v54  ;;  %v2622_v54 = vpack.c.bf16 %v516_v49, %v515_v48  ;;  %v1411_v49 = vld [vmem:[#allocation8 + $0x50] sm:$0xff] }
 0x145   :  { %2601 = vmatpush3.bf16.msra.mxu1 %v2600_v53  ;;  %v2652_v53 = vpack.c.bf16 %v530_v47, %v529_v45  ;;  %v2676_v45 = vpack.c.bf16 %v1408_v44, %v1407_v43  ;;  %v1410_v47 = vld [vmem:[#allocation8 + $0x48] sm:$0xff] }
 0x146   :  { %2635 = vmatprep.subr.bf16.mxu1 %v2634_v58  ;;  %1185 = vmatmul.mubr.f32.vlgmr.msra.gmra.mrb[8].mxu0 %v161_v0  ;;  %v2654_v58 = vpack.c.bf16 %v548_v51, %v547_v50  ;;  %v2624_v0 = vpack.c.bf16 %v500_v56, %v499_v55  ;;  %v1412_v50 = vld [vmem:[#allocation8 + $0x58] sm:$0xff] }
 0x147   :  { %2605 = vmatpush3.bf16.msra.mxu0 %v2604_v1  ;;  %1324 = vmatprep.mubr.f32.mxu0 %v166_v14  ;;  %v2656_v1 = vpack.c.bf16 %v532_v59, %v531_v57  ;;  %v2682_v51 = vpack.c.bf16 %v1412_v50, %v1411_v49 }
 0x148   :  { %1255 = vmatmul.mubr.f32.vlgmr.msra.gmra.mrb[8].mxu1 %v163_v2  ;;  %2607 = vmatprep.subr.bf16.mxu0 %v2606_v4  ;;  %v2626_v2 = vpack.c.bf16 %v518_v61, %v517_v60  ;;  %v502_v4 = vld [vmem:[#allocation5 + $0xa68] sm:$0xff] }
 0x149   :  { %2637 = vmatpush3.bf16.msra.mxu1 %v2636_v3  ;;  %1394 = vmatprep.mubr.f32.mxu1 %v168_v16  ;;  %v501_v3 = vld [vmem:[#allocation5 + $0xa60] sm:$0xff]  ;;  %v504_v16 = vld [vmem:[#allocation5 + $0xa78] sm:$0xff] }
 0x14a   :  { %2639 = vmatprep.subr.bf16.mxu1 %v2638_v8  ;;  %v519_v8 = vld [vmem:[#allocation5 + $0xaf0] sm:$0xff]  ;;  %v2628_v12 = vpack.c.bf16 %v502_v4, %v501_v3  ;;  %v1495_v3 = vld [vmem:[#allocation11] sm:$0xff] }
 0x14b   :  { %2609 = vmatpush3.bf16.msra.mxu0 %v2608_v15  ;;  %v2630_v14 = vpack.c.bf16 %v520_v9, %v519_v8  ;;  %v503_v15 = vld [vmem:[#allocation5 + $0xa70] sm:$0xff]  ;;  %v2694_v8 = vpack.c.bf16 %v1498_v7, %v1497_v5  ;;  %v1499_v9 = vld [vmem:[#allocation11 + $0x20] sm:$0xff] }
 0x14c   :  { %2611 = vmatprep.subr.bf16.mxu0 %v2610_v18  ;;  %v535_v18 = vld [vmem:[#allocation5 + $0xb70] sm:$0xff]  ;;  %v2632_v20 = vpack.c.bf16 %v504_v16, %v503_v15  ;;  %v1503_v15 = vld [vmem:[#allocation11 + $0x40] sm:$0xff] }
 0x14d   :  { %2641 = vmatpush3.bf16.msra.mxu1 %v2640_v17  ;;  %v2662_v17 = vpack.c.bf16 %v552_v11, %v551_v10  ;;  %v2664_v21 = vpack.c.bf16 %v536_v19, %v535_v18  ;;  %v1496_v4 = vld [vmem:[#allocation11 + $0x8] sm:$0xff]  ;;  %v1505_v18 = vld [vmem:[#allocation11 + $0x50] sm:$0xff]  ;;  %v1506_v19 = vld [vmem:[#allocation11 + $0x58] sm:$0xff] }
 0x14e   :  { %2643 = vmatprep.subr.bf16.mxu1 %v2642_v22  ;;  %v165_v22 = vld [vmem:[#allocation2 + $0xa0] sm:$0xff]  ;;  %v1500_v10 = vld [vmem:[#allocation11 + $0x28] sm:$0xff] }
 0x14f   :  { %2613 = vmatpush3.bf16.msra.mxu0 %v2612_v28  ;;  %v2697_v11 = vpack.c.bf16 %v1500_v10, %v1499_v9  ;;  %v1504_v16 = vld [vmem:[#allocation11 + $0x48] sm:$0xff]  ;;  %v1596_v7 = vld [vmem:[#allocation14 + $0x38] sm:$0xff] }
 0x150   :  { %2615 = vmatprep.subr.bf16.mxu0 %v2614_v30  ;;  %v1594_v5 = vld [vmem:[#allocation14 + $0x28] sm:$0xff]  ;;  %v1597_v9 = vld [vmem:[#allocation14 + $0x40] sm:$0xff] }
 0x151   :  { %2645 = vmatpush3.bf16.msra.mxu1 %v2644_v29  ;;  %v1598_v10 = vld [vmem:[#allocation14 + $0x48] sm:$0xff] }
 0x152   :  { %2647 = vmatprep.subr.bf16.mxu1 %v2646_v34  ;;  %v1402_v34 = vld [vmem:[#allocation8 + $0x8] sm:$0xff] }
 0x153   :  { %2617 = vmatpush3.bf16.msra.mxu0 %v2616_v40  ;;  %v2667_v37 = vpack.c.bf16 %v1402_v34, %v1401_v33  ;;  %v1405_v40 = vld [vmem:[#allocation8 + $0x20] sm:$0xff] }
 0x154   :  { %2619 = vmatprep.subr.bf16.mxu0 %v2618_v42 }
 0x155   :  { %2649 = vmatpush3.bf16.msra.mxu1 %v2648_v41  ;;  %v1406_v41 = vld [vmem:[#allocation8 + $0x28] sm:$0xff] }
 0x156   :  { %2651 = vmatprep.subr.bf16.mxu1 %v2650_v46  ;;  %v2673_v42 = vpack.c.bf16 %v1406_v41, %v1405_v40  ;;  %v1409_v46 = vld [vmem:[#allocation8 + $0x40] sm:$0xff] }
 0x157   :  { %2621 = vmatpush3.bf16.msra.mxu0 %v2620_v52  ;;  %v2679_v48 = vpack.c.bf16 %v1410_v47, %v1409_v46 }
 0x158   :  { %2623 = vmatprep.subr.bf16.mxu0 %v2622_v54  ;;  %v1414_v54 = vld [vmem:[#allocation8 + $0x68] sm:$0xff] }
 0x159   :  { %2653 = vmatpush3.bf16.msra.mxu1 %v2652_v53  ;;  %v1413_v53 = vld [vmem:[#allocation8 + $0x60] sm:$0xff] }
 0x15a   :  { %2655 = vmatprep.subr.bf16.mxu1 %v2654_v58  ;;  %v2685_v57 = vpack.c.bf16 %v1414_v54, %v1413_v53 }
 0x15b   :  { %2625 = vmatpush3.bf16.msra.mxu0 %v2624_v0  ;;  %v2688_v0 = vpack.c.bf16 %v1416_v63, %v1415_v62  ;;  %v1590_v62 = vld [vmem:[#allocation14 + $0x8] sm:$0xff]  ;;  %v1591_v63 = vld [vmem:[#allocation14 + $0x10] sm:$0xff] }
 0x15c   :  { %2627 = vmatprep.subr.bf16.mxu0 %v2626_v2  ;;  %v2998_v2 = vmov 0.0  }
 0x15d   :  { %2657 = vmatpush3.bf16.msra.mxu1 %v2656_v1 }
 0x15e   :  { %2659 = vmatprep.subr.bf16.mxu1 %v2658_v6  ;;  %v2691_v6 = vpack.c.bf16 %v1496_v4, %v1495_v3  ;;  %v1593_v4 = vld [vmem:[#allocation14 + $0x20] sm:$0xff] }
 0x15f   :  { %2629 = vmatpush3.bf16.msra.mxu0 %v2628_v12  ;;  %v1501_v12 = vld [vmem:[#allocation11 + $0x30] sm:$0xff] }
 0x160   :  { %2631 = vmatprep.subr.bf16.mxu0 %v2630_v14 }
 0x161   :  { %2661 = vmatpush3.bf16.msra.mxu1 %v2660_v13  ;;  %v1502_v13 = vld [vmem:[#allocation11 + $0x38] sm:$0xff] }
 0x162   :  { %2663 = vmatprep.subr.bf16.mxu1 %v2662_v17  ;;  %v2700_v14 = vpack.c.bf16 %v1502_v13, %v1501_v12  ;;  %v2703_v17 = vpack.c.bf16 %v1504_v16, %v1503_v15  ;;  %v1599_v12 = vld [vmem:[#allocation14 + $0x50] sm:$0xff]  ;;  %v1600_v13 = vld [vmem:[#allocation14 + $0x58] sm:$0xff]  ;;  %v1601_v15 = vld [vmem:[#allocation14 + $0x60] sm:$0xff] }
 0x163   :  { %2633 = vmatpush3.bf16.msra.mxu0 %v2632_v20  ;;  %v2706_v20 = vpack.c.bf16 %v1506_v19, %v1505_v18  ;;  %v1602_v16 = vld [vmem:[#allocation14 + $0x68] sm:$0xff]  ;;  %v1703_v18 = vld [vmem:[#allocation10] ss:$0 sm:$0xff] }
 0x164   :  { %2666 = vmatprep.subr.bf16.mxu0 %v2996_v36 }
 0x165   :  { %2665 = vmatpush3.bf16.msra.mxu1 %v2664_v21  ;;  %v1507_v21 = vld [vmem:[#allocation11 + $0x60] sm:$0xff] }
 0x166   :  { %1325 = vmatmul.mubr.f32.vlgmr.msra.gmra.mrb[10].mxu0 %v165_v22  ;;  %2690 = vmatprep.subr.bf16.mxu1 %v2996_v36  ;;  %v1508_v22 = vld [vmem:[#allocation11 + $0x68] sm:$0xff] }
 0x167   :  { %2668 = vmatpush3.bf16.msra.mxu0 %v2667_v37  ;;  %2209 = vmatprep.mubr.msk.f32.mxu0 %vm2997_vm0, %v2998_v2 }
 0x168   :  { %1395 = vmatmul.mubr.f32.vlgmr.msra.gmra.mrb[10].mxu1 %v167_v23  ;;  %2669 = vmatprep.subr.bf16.mxu0 %v2996_v36 }
 0x169   :  { %2244 = vmatprep.mubr.msk.f32.mxu1 %vm2997_vm0, %v2998_v2  ;;  %2692 = vmatpush3.bf16.msra.mxu1 %v2691_v6  ;;  %v2721_v6 = vpack.c.bf16 %v1594_v5, %v1593_v4 }
 0x16a   :  { %2693 = vmatprep.subr.bf16.mxu1 %v2996_v36 }
 0x16b   :  { %2671 = vmatpush3.bf16.msra.mxu0 %v2670_v39 }
 0x16c   :  { %2672 = vmatprep.subr.bf16.mxu0 %v2996_v36 }
 0x16d   :  { %2695 = vmatpush3.bf16.msra.mxu1 %v2694_v8 }
 0x16e   :  { %2696 = vmatprep.subr.bf16.mxu1 %v2996_v36 }
 0x16f   :  { %2674 = vmatpush3.bf16.msra.mxu0 %v2673_v42 }
 0x170   :  { %2675 = vmatprep.subr.bf16.mxu0 %v2996_v36 }
 0x171   :  { %2698 = vmatpush3.bf16.msra.mxu1 %v2697_v11  ;;  %v2727_v11 = vpack.c.bf16 %v1598_v10, %v1597_v9 }
 0x172   :  { %2699 = vmatprep.subr.bf16.mxu1 %v2996_v36 }
 0x173   :  { %2677 = vmatpush3.bf16.msra.mxu0 %v2676_v45 }
 0x174   :  { %2678 = vmatprep.subr.bf16.mxu0 %v2996_v36 }
 0x175   :  { %2701 = vmatpush3.bf16.msra.mxu1 %v2700_v14  ;;  %v2730_v14 = vpack.c.bf16 %v1600_v13, %v1599_v12 }
 0x176   :  { %2702 = vmatprep.subr.bf16.mxu1 %v2996_v36 }
 0x177   :  { %2680 = vmatpush3.bf16.msra.mxu0 %v2679_v48 }
 0x178   :  { %2681 = vmatprep.subr.bf16.mxu0 %v2996_v36 }
 0x179   :  { %2704 = vmatpush3.bf16.msra.mxu1 %v2703_v17  ;;  %v2733_v17 = vpack.c.bf16 %v1602_v16, %v1601_v15 }
 0x17a   :  { %2705 = vmatprep.subr.bf16.mxu1 %v2996_v36 }
 0x17b   :  { %2683 = vmatpush3.bf16.msra.mxu0 %v2682_v51 }
 0x17c   :  { %2684 = vmatprep.subr.bf16.mxu0 %v2996_v36 }
 0x17d   :  { %2707 = vmatpush3.bf16.msra.mxu1 %v2706_v20 }
 0x17e   :  { %2708 = vmatprep.subr.bf16.mxu1 %v2996_v36 }
 0x17f   :  { %2686 = vmatpush3.bf16.msra.mxu0 %v2685_v57 }
 0x180   :  { %2687 = vmatprep.subr.bf16.mxu0 %v2996_v36 }
 0x183   :  { %2689 = vmatpush3.bf16.msra.mxu0 %v2688_v0 }
 0x184   :  { %2714 = vmatprep.subr.bf16.mxu0 %v2996_v36 }
 0x199   :  { %v1738_v24 = vpop.f32.mrb[0].mxu0 }
 0x19a   :  { %v1739_v26 = vpop.f32.mrb[1].mxu0 }
 0x19b   :  { %v1773_v27 = vpop.f32.mrb[0].mxu1  ;;  %v1740_v28 = vadd.f32 %v1739_v26, %v1738_v24  ;;  %v2709_v26 = vpack.c.bf16 %v1508_v22, %v1507_v21 }
 0x19c   :  { %v1774_v29 = vpop.f32.mrb[1].mxu1 }
 0x19d   :  { %v1775_v30 = vadd.f32 %v1774_v29, %v1773_v27  ;;  %v627_v31 = vadd.f32 %v1740_v28, %v1702_v25  ;;  %2710 = vmatpush3.bf16.msra.mxu1 %v2709_v26  ;;  %v1704_v26 = vld [vmem:[#allocation13] ss:$0 sm:$0xff] }
 0x19e   :  { %2711 = vmatprep.subr.bf16.mxu1 %v2996_v36 }
 0x19f   :  { %v697_v32 = vadd.f32 %v1775_v30, %v627_v31 }
 0x1b9   :  { %v1808_v52 = vpop.f32.mrb[2].mxu0 }
 0x1ba   :  { %v1809_v55 = vpop.f32.mrb[3].mxu0 }
 0x1bb   :  { %v1843_v56 = vpop.f32.mrb[2].mxu1  ;;  %v1810_v58 = vadd.f32 %v1809_v55, %v1808_v52 }
 0x1bc   :  { %v1844_v59 = vpop.f32.mrb[3].mxu1 }
 0x1bd   :  { %v1845_v60 = vadd.f32 %v1844_v59, %v1843_v56  ;;  %v767_v61 = vadd.f32 %v1810_v58, %v697_v32  ;;  %v1509_v58 = vld [vmem:[#allocation11 + $0x70] sm:$0xff]  ;;  %v1510_v59 = vld [vmem:[#allocation11 + $0x78] sm:$0xff] }
 0x1bf   :  { %v837_v1 = vadd.f32 %v1845_v60, %v767_v61  ;;  %v2712_v60 = vpack.c.bf16 %v1510_v59, %v1509_v58  ;;  %v1589_v61 = vld [vmem:[#allocation14] sm:$0xff] }
 0x1c0   :  { %v2715_v0 = vpack.c.bf16 %v1590_v62, %v1589_v61 }
 0x1c1   :  { %2713 = vmatpush3.bf16.msra.mxu1 %v2712_v60 }
 0x1d9   :  { %v1878_v23 = vpop.f32.mrb[4].mxu0 }
 0x1da   :  { %v1879_v24 = vpop.f32.mrb[5].mxu0 }
 0x1db   :  { %v1913_v25 = vpop.f32.mrb[4].mxu1  ;;  %v1880_v27 = vadd.f32 %v1879_v24, %v1878_v23  ;;  %v1603_v23 = vld [vmem:[#allocation14 + $0x70] sm:$0xff]  ;;  %v1604_v24 = vld [vmem:[#allocation14 + $0x78] sm:$0xff] }
 0x1dc   :  { %v1914_v28 = vpop.f32.mrb[5].mxu1 }
 0x1dd   :  { %v1915_v29 = vadd.f32 %v1914_v28, %v1913_v25  ;;  %v907_v30 = vadd.f32 %v1880_v27, %v837_v1  ;;  %v1592_v1 = vld [vmem:[#allocation14 + $0x18] sm:$0xff]  ;;  %v2736_v25 = vpack.c.bf16 %v1604_v24, %v1603_v23 }
 0x1de   :  { %v2718_v3 = vpack.c.bf16 %v1592_v1, %v1591_v63 }
 0x1df   :  { %v977_v31 = vadd.f32 %v1915_v29, %v907_v30 }
 0x1f9   :  { %v1948_v32 = vpop.f32.mrb[6].mxu0 }
 0x1fa   :  { %v1949_v33 = vpop.f32.mrb[7].mxu0 }
 0x1fb   :  { %v1983_v34 = vpop.f32.mrb[6].mxu1  ;;  %v1950_v35 = vadd.f32 %v1949_v33, %v1948_v32 }
 0x1fc   :  { %v1984_v37 = vpop.f32.mrb[7].mxu1 }
 0x1fd   :  { %v1985_v38 = vadd.f32 %v1984_v37, %v1983_v34  ;;  %v1047_v39 = vadd.f32 %v1950_v35, %v977_v31  ;;  %v1705_v31 = vld [vmem:[#allocation16] ss:$0 sm:$0xff] }
 0x1ff   :  { %v1117_v40 = vadd.f32 %v1985_v38, %v1047_v39 }
 0x219   :  { %v2018_v41 = vpop.f32.mrb[8].mxu0 }
 0x21a   :  { %v2019_v42 = vpop.f32.mrb[9].mxu0 }
 0x21b   :  { %v2053_v43 = vpop.f32.mrb[8].mxu1  ;;  %v2020_v44 = vadd.f32 %v2019_v42, %v2018_v41 }
 0x21c   :  { %v2054_v45 = vpop.f32.mrb[9].mxu1 }
 0x21d   :  { %v2055_v46 = vadd.f32 %v2054_v45, %v2053_v43  ;;  %v1187_v47 = vadd.f32 %v2020_v44, %v1117_v40 }
 0x21f   :  { %v1257_v48 = vadd.f32 %v2055_v46, %v1187_v47 }
 0x239   :  { %v2088_v49 = vpop.f32.mrb[10].mxu0 }
 0x23a   :  { %v2089_v50 = vpop.f32.mrb[11].mxu0 }
 0x23b   :  { %v2123_v51 = vpop.f32.mrb[10].mxu1  ;;  %v2090_v52 = vadd.f32 %v2089_v50, %v2088_v49 }
 0x23c   :  { %v2124_v53 = vpop.f32.mrb[11].mxu1 }
 0x23d   :  { %v2125_v54 = vadd.f32 %v2124_v53, %v2123_v51  ;;  %v1327_v55 = vadd.f32 %v2090_v52, %v1257_v48 }
 0x23f   :  { %v1397_v56 = vadd.f32 %v2125_v54, %v1327_v55 }
 0x241   :  { %v1400_v57 = vmax.f32 %v1397_v56, 0.0 }
 0x243   :  { %2210 = vmatmul.mubr.f32.vlgmr.msra.gmra.mrb[12].mxu0 %v1400_v57 }
 0x244   :  { %2279 = vmatprep.mubr.msk.f32.mxu0 %vm2997_vm0, %v2998_v2  ;;  %2716 = vmatpush3.bf16.msra.mxu0 %v2715_v0  ;;  %v1595_v2 = vld [vmem:[#allocation14 + $0x30] sm:$0xff] }
 0x245   :  { %2717 = vmatprep.subr.bf16.mxu0 %v2996_v36  ;;  %v2724_v8 = vpack.c.bf16 %v1596_v7, %v1595_v2 }
 0x248   :  { %2719 = vmatpush3.bf16.msra.mxu0 %v2718_v3 }
 0x249   :  { %2720 = vmatprep.subr.bf16.mxu0 %v2996_v36 }
 0x24c   :  { %2722 = vmatpush3.bf16.msra.mxu0 %v2721_v6 }
 0x24d   :  { %2723 = vmatprep.subr.bf16.mxu0 %v2996_v36 }
 0x250   :  { %2725 = vmatpush3.bf16.msra.mxu0 %v2724_v8 }
 0x251   :  { %2726 = vmatprep.subr.bf16.mxu0 %v2996_v36 }
 0x254   :  { %2728 = vmatpush3.bf16.msra.mxu0 %v2727_v11 }
 0x255   :  { %2729 = vmatprep.subr.bf16.mxu0 %v2996_v36 }
 0x258   :  { %2731 = vmatpush3.bf16.msra.mxu0 %v2730_v14 }
 0x259   :  { %2732 = vmatprep.subr.bf16.mxu0 %v2996_v36 }
 0x25c   :  { %2734 = vmatpush3.bf16.msra.mxu0 %v2733_v17 }
 0x25d   :  { %2735 = vmatprep.subr.bf16.mxu0 %v2996_v36 }
 0x260   :  { %2737 = vmatpush3.bf16.msra.mxu0 %v2736_v25 }
 0x316   :  { %v1490_v19 = vpop.f32.mrb[12].mxu0 }
 0x317   :  { %v1491_v20 = vadd.f32 %v1703_v18, %v1490_v19  ;;  %v2211_v21 = vpop.f32.mrb[13].mxu0 }
 0x319   :  { %v1494_v22 = vmax.f32 %v1491_v20, 0.0 }
 0x31b   :  { %2245 = vmatmul.mubr.f32.vlgmr.msra.gmra.mrb[12].mxu1 %v1494_v22 }
 0x3ee   :  { %v1584_v27 = vpop.f32.mrb[12].mxu1 }
 0x3ef   :  { %v1585_v28 = vadd.f32 %v1704_v26, %v1584_v27  ;;  %v2246_v29 = vpop.f32.mrb[13].mxu1 }
 0x3f1   :  { %v1588_v30 = vmax.f32 %v1585_v28, 0.0 }
 0x3f3   :  { %2280 = vmatmul.mubr.f32.vlgmr.msra.gmra.mrb[14].mxu0 %v1588_v30 }
 0x4c6   :  { %v1678_v36 = vpop.f32.mrb[14].mxu0 }
 0x4c7   :  { %v1679_v32 = vadd.f32 %v1705_v31, %v1678_v36  ;;  %v2281_v33 = vpop.f32.mrb[15].mxu0 }
 0x4c9   :  { %1682 = vst [vmem:[#allocation17] sm:$0xff] %v1679_v32 }
 0x4ca   :  { %2962 = shalt.err (!%p2959_p6)
}
 0x4cb   :  { %s2963_s20 = scalar_lea.hbm %s3221_s9, 128 }
 0x4cc   :  { %p2964_p7 = scmp.ne.s32.totalorder %s3221_s9, %s2963_s20  ;;  %p2967_p8 = scmp.lt.u32.totalorder %s2963_s20, %s3221_s9 }
 0x4ce   :  { %p2969_p9 = pnand %p2967_p8, %p2964_p7 }
 0x4d0   :  { %2972 = shalt.err (!%p2969_p9)
}
 0x4d1   :  { %1692 = dma.vmem_to_hbm [thread:$0]  %s1690_s24, 128, %s3221_s9, [#allocation4]  }
 0x4d2   :  { %2983 = dma.done.wait [#allocation4], 128  }
 0x4d3   :  { %2984 = vsyncadd [#allocation4], 4294967168 }
 0x4d4   :  { %1696 = vsyncpa [#allocation3], 1 }
 0x4d5   :  { %1697 = vsyncpa [#allocation6], 1 }
 0x4d6   :  { %1698 = vsyncpa [#allocation9], 1 }
 0x4d7   :  { %1699 = vsyncpa [#allocation12], 1 }
 0x4d8   :  { %1700 = vsyncpa [#allocation15], 1 }
 0x4d9   :  { %1701 = vsyncpa [#allocation4], 1 }

</bundles_post_ra>
